<compile_context>
chip_gen: v7x
topology: tpu7x:2x2x1
jax: 0.10.0
libtpu: 0.0.40
codegen_flags: <defaults>
</compile_context>

<pallas_src>
import math
import functools

import jax
import jax.numpy as jnp
from jax.experimental import pallas as pl
from jax.experimental.pallas import tpu as pltpu


# ----------------------------- shared math helpers -----------------------------

def _layer_norm(x, w, b, eps=1e-5):
    mu = jnp.mean(x, axis=-1, keepdims=True)
    var = jnp.mean((x - mu) ** 2, axis=-1, keepdims=True)
    return (x - mu) * jax.lax.rsqrt(var + eps) * w + b


def make_pos_encoding(seq_len, emb_size):
    den = jnp.exp(jnp.arange(0, emb_size, 2, dtype=jnp.float32)
                  * (-math.log(10000.0) / emb_size))
    pos = jnp.arange(seq_len, dtype=jnp.float32)[:, None]
    pe = jnp.zeros((seq_len, emb_size), jnp.float32)
    pe = pe.at[:, 0::2].set(jnp.sin(pos * den))
    pe = pe.at[:, 1::2].set(jnp.cos(pos * den))
    return pe


# --------------------------------- the kernel ----------------------------------
# grid = (L,)  -- one grid step per encoder layer ("arbitrary": layers are sequential)

def spatial_msm_kernel(
    x_ref,       # (B, S, D)     f32   batch-first src (read only at l == 0)
    mask_ref,    # (B, S, S)     f32   additive mask (attn_mask + key-padding bias)
    vmask_ref,   # (B, S, 1)     f32   (1 - pad) / src_len  pooling weights
    pe_ref,      # (S, D)        f32   positional encoding
    win_ref,     # (1, D, 3D)    bf16  packed in_proj weight (this layer, pre-transposed)
    bin_ref,     # (1, 1, 3D)    f32   packed in_proj bias
    wo_ref,      # (1, D, D)     bf16  out_proj weight (pre-transposed)
    bo_ref,      # (1, 1, D)     f32
    ln1w_ref, ln1b_ref,          # (1, 1, D) f32
    w1_ref,      # (1, D, H)     bf16  linear1 (pre-transposed)
    b1_ref,      # (1, 1, H)     f32
    w2_ref,      # (1, H, D)     bf16  linear2 (pre-transposed)
    b2_ref,      # (1, 1, D)     f32
    ln2w_ref, ln2b_ref,          # (1, 1, D) f32
    out_ref,     # (B, D)        f32   masked-mean pooled output (written at last layer)
    attn_ref,    # (B, S, S)     f32   head-averaged attention of the last layer
    x_res,       # scratch: (B*S, D) f32 residual stream, persists across grid steps
    *, nhead,
):
    l = pl.program_id(0)
    n_layers = pl.num_programs(0)
    B, S, D = x_ref.shape
    dk = D // nhead
    scale = 1.0 / math.sqrt(dk)
    bf16 = jnp.bfloat16
    f32 = jnp.float32

    # positional encoding (pos_dropout == identity in eval mode); f32 residual stream.
    @pl.when(l == 0)
    def _():
        x_res[...] = (x_ref[...] + pe_ref[...]).reshape(B * S, D)

    x = x_res[...]                                  # (B*S, D) f32
    mask = mask_ref[...]                            # (B, S, S) additive

    # ---- fused in-projection: ONE (B*S, D) @ (D, 3D) bf16 matmul, f32 accumulation
    qkv = jnp.dot(x.astype(bf16), win_ref[0],
                  preferred_element_type=f32) + bin_ref[0]       # (B*S, 3D) f32
    q = (qkv[:, :D] * scale).astype(bf16)           # scale applied in f32 (accuracy)
    k = qkv[:, D:2 * D].astype(bf16)
    v = qkv[:, 2 * D:].astype(bf16)

    # ---- attention core: static dk-wide lane slices per head, batched over B.
    # (No 4-D transposes; leading-dim reshapes only.)
    ctx_heads = []
    attn_sum = jnp.zeros((B, S, S), f32)
    for h in range(nhead):
        qh = q[:, h * dk:(h + 1) * dk].reshape(B, S, dk)
        kh = k[:, h * dk:(h + 1) * dk].reshape(B, S, dk)
        vh = v[:, h * dk:(h + 1) * dk].reshape(B, S, dk)
        s = jnp.einsum('bqd,bkd->bqk', qh, kh,
                       preferred_element_type=f32) + mask        # (B, S, S)
        s = s - jnp.max(s, axis=-1, keepdims=True)
        p = jnp.exp(s)
        p = p * pl.reciprocal(jnp.sum(p, axis=-1, keepdims=True), approx=True)
        attn_sum = attn_sum + p
        ctx_heads.append(jnp.einsum('bqk,bkd->bqd', p.astype(bf16), vh,
                                    preferred_element_type=f32))  # (B, S, dk)

    # head-averaged attention weights are a user-visible output of the LAST layer only.
    @pl.when(l == n_layers - 1)
    def _():
        attn_ref[...] = attn_sum * (1.0 / nhead)

    # ---- fused out-projection: concat heads, then ONE (B*S, D) @ (D, D) matmul ----
    ctx = jnp.concatenate(ctx_heads, axis=-1).reshape(B * S, D)   # f32
    attn_out = jnp.dot(ctx.astype(bf16), wo_ref[0],
                       preferred_element_type=f32) + bo_ref[0]
    x = _layer_norm(x + attn_out, ln1w_ref[0], ln1b_ref[0])

    # ---- feed forward (dense bf16 matmuls at M = B*S rows, f32 accumulation) ----
    hdn = jnp.dot(x.astype(bf16), w1_ref[0], preferred_element_type=f32) + b1_ref[0]
    hdn = jnp.maximum(hdn, 0.0)                                   # relu
    ffn = jnp.dot(hdn.astype(bf16), w2_ref[0], preferred_element_type=f32) + b2_ref[0]
    x = _layer_norm(x + ffn, ln2w_ref[0], ln2b_ref[0])
    x_res[...] = x

    # ---- masked mean pooling (VPU reduction; 1/src_len folded into vmask) ----
    @pl.when(l == n_layers - 1)
    def _():
        out_ref[...] = jnp.sum(x.reshape(B, S, D) * vmask_ref[...], axis=1)


# --------------------------------- the wrapper ----------------------------------

def _prep_params(params):
    """Torch-layout params -> kernel layout: pre-transposed, bf16 MXU operands."""
    bf = lambda t: t.astype(jnp.bfloat16)
    f32 = lambda t: t.astype(jnp.float32)
    return dict(
        w_in=bf(jnp.transpose(params["inw"], (0, 2, 1))),    # (L, D, 3D)
        b_in=f32(params["inb"]),                              # (L, 1, 3D)
        wo=bf(jnp.transpose(params["outw"], (0, 2, 1))),      # (L, D, D)
        bo=f32(params["outb"]),                               # (L, 1, D)
        ln1w=f32(params["ln1w"]), ln1b=f32(params["ln1b"]),
        w1=bf(jnp.transpose(params["l1w"], (0, 2, 1))),       # (L, D, H)
        b1=f32(params["l1b"]),
        w2=bf(jnp.transpose(params["l2w"], (0, 2, 1))),       # (L, H, D)
        b2=f32(params["l2b"]),
        ln2w=f32(params["ln2w"]), ln2b=f32(params["ln2b"]),
    )


@functools.partial(jax.jit, static_argnames=("nhead",))
def spatial_msm_forward(src_sbd, attn_mask, src_padding_mask, src_len, params, *, nhead):
    """src_sbd: (S, B, D) f32 (PyTorch transformer layout)
       attn_mask: (S, S) f32 additive
       src_padding_mask: (B, S) bool (True = pad)
       src_len: (B,) f32
    Returns: pooled (B, D), last-layer head-averaged attention (B, S, S)."""
    S, B, D = src_sbd.shape
    L = params["inw"].shape[0]
    H = params["l1w"].shape[1]
    kp = _prep_params(params)

    x = jnp.transpose(src_sbd, (1, 0, 2)).astype(jnp.float32)       # (B, S, D)
    padf = src_padding_mask.astype(jnp.float32)                     # (B, S)
    # additive attention mask, built once (finite -1e30 so fully-masked rows are NaN-safe)
    mask = (attn_mask.astype(jnp.float32)[None, :, :]
            + jnp.where(padf > 0.0, -1e30, 0.0)[:, None, :])        # (B, S, S)
    # fold 1/src_len into the pooling weights (guarded against src_len == 0)
    inv_len = jnp.where(src_len > 0, 1.0 / src_len.astype(jnp.float32), 0.0)
    vmask = ((1.0 - padf) * inv_len[:, None])[:, :, None]           # (B, S, 1)
    pe = make_pos_encoding(S, D)

    grid_spec = pltpu.PrefetchScalarGridSpec(
        num_scalar_prefetch=0,
        grid=(L,),                                   # one step per encoder layer
        in_specs=[
            pl.BlockSpec((B, S, D), lambda l: (0, 0, 0)),        # x
            pl.BlockSpec((B, S, S), lambda l: (0, 0, 0)),        # additive mask
            pl.BlockSpec((B, S, 1), lambda l: (0, 0, 0)),        # pooling weights
            pl.BlockSpec((S, D), lambda l: (0, 0)),              # positional encoding
            pl.BlockSpec((1, D, 3 * D), lambda l: (l, 0, 0)),    # packed in_proj W
            pl.BlockSpec((1, 1, 3 * D), lambda l: (l, 0, 0)),    # packed in_proj b
            pl.BlockSpec((1, D, D), lambda l: (l, 0, 0)),        # out_proj W
            pl.BlockSpec((1, 1, D), lambda l: (l, 0, 0)),        # out_proj b
            pl.BlockSpec((1, 1, D), lambda l: (l, 0, 0)),        # ln1 w
            pl.BlockSpec((1, 1, D), lambda l: (l, 0, 0)),        # ln1 b
            pl.BlockSpec((1, D, H), lambda l: (l, 0, 0)),        # linear1 W
            pl.BlockSpec((1, 1, H), lambda l: (l, 0, 0)),        # linear1 b
            pl.BlockSpec((1, H, D), lambda l: (l, 0, 0)),        # linear2 W
            pl.BlockSpec((1, 1, D), lambda l: (l, 0, 0)),        # linear2 b
            pl.BlockSpec((1, 1, D), lambda l: (l, 0, 0)),        # ln2 w
            pl.BlockSpec((1, 1, D), lambda l: (l, 0, 0)),        # ln2 b
        ],
        out_specs=[
            pl.BlockSpec((B, D), lambda l: (0, 0)),              # pooled
            pl.BlockSpec((B, S, S), lambda l: (0, 0, 0)),        # last-layer attention
        ],
        scratch_shapes=[pltpu.VMEM((B * S, D), jnp.float32)],    # residual stream
    )

    pooled, attn = pl.pallas_call(
        functools.partial(spatial_msm_kernel, nhead=nhead),
        out_shape=(jax.ShapeDtypeStruct((B, D), jnp.float32),
                   jax.ShapeDtypeStruct((B, S, S), jnp.float32)),
        grid_spec=grid_spec,
        compiler_params=pltpu.CompilerParams(
            dimension_semantics=("arbitrary",),      # layers are sequential
            vmem_limit_bytes=32 * 1024 * 1024),
    )(x, mask, vmask, pe,
      kp["w_in"], kp["b_in"], kp["wo"], kp["bo"], kp["ln1w"], kp["ln1b"],
      kp["w1"], kp["b1"], kp["w2"], kp["b2"], kp["ln2w"], kp["ln2b"])
    return pooled, attn


# ----------------------------- pure-JAX reference -------------------------------

def reference_forward(src_sbd, attn_mask, src_padding_mask, src_len, params, nhead):
    S, B, D = src_sbd.shape
    L = params["inw"].shape[0]
    dk = D // nhead
    scale = 1.0 / math.sqrt(dk)

    pe = make_pos_encoding(S, D)
    x = src_sbd + pe[:, None, :]
    x = jnp.transpose(x, (1, 0, 2))                     # (B, S, D)
    pad = src_padding_mask.astype(jnp.float32)          # (B, S)
    amask = attn_mask.astype(jnp.float32)

    attn = None
    for l in range(L):
        qkv = x @ params["inw"][l].T + params["inb"][l]
        q, k, v = jnp.split(qkv, 3, axis=-1)
        sh = lambda t: t.reshape(B, S, nhead, dk).transpose(0, 2, 1, 3)
        qh, kh, vh = sh(q), sh(k), sh(v)
        s = jnp.einsum("bhqd,bhkd->bhqk", qh * scale, kh)
        s = s + amask[None, None]
        s = s + jnp.where(pad[:, None, None, :] > 0, -jnp.inf, 0.0)
        p = jax.nn.softmax(s, axis=-1)
        attn = p.mean(axis=1)                           # (B, S, S)
        ctx = jnp.einsum("bhqk,bhkd->bhqd", p, vh).transpose(0, 2, 1, 3).reshape(B, S, D)
        src2 = ctx @ params["outw"][l].T + params["outb"][l]
        x = _layer_norm(x + src2, params["ln1w"][l], params["ln1b"][l])
        hdn = jax.nn.relu(x @ params["l1w"][l].T + params["l1b"][l])
        src2 = hdn @ params["l2w"][l].T + params["l2b"][l]
        x = _layer_norm(x + src2, params["ln2w"][l], params["ln2b"][l])

    valid = 1.0 - pad
    pooled = jnp.einsum("bs,bsd->bd", valid, x) / src_len.astype(jnp.float32)[:, None]
    return pooled, attn


# ------------------------------------ main --------------------------------------

def init_params(key, D, H, L):
    ks = jax.random.split(key, 12)
    nrm = lambda k, shape, s: s * jax.random.normal(k, shape, jnp.float32)
    return dict(
        inw=nrm(ks[0], (L, 3 * D, D), 0.1),
        inb=nrm(ks[1], (L, 1, 3 * D), 0.02),
        outw=nrm(ks[2], (L, D, D), 0.1),
        outb=nrm(ks[3], (L, 1, D), 0.02),
        ln1w=jnp.ones((L, 1, D), jnp.float32) + nrm(ks[4], (L, 1, D), 0.01),
        ln1b=nrm(ks[5], (L, 1, D), 0.02),
        l1w=nrm(ks[6], (L, H, D), 0.1),
        l1b=nrm(ks[7], (L, 1, H), 0.02),
        l2w=nrm(ks[8], (L, D, H), 0.1),
        l2b=nrm(ks[9], (L, 1, D), 0.02),
        ln2w=jnp.ones((L, 1, D), jnp.float32) + nrm(ks[10], (L, 1, D), 0.01),
        ln2b=nrm(ks[11], (L, 1, D), 0.02),
    )


if __name__ == "__main__":
    SEQ, BATCH = 8, 2
    NINPUT, NHIDDEN, NHEAD, NLAYER = 32, 64, 4, 2

    key = jax.random.PRNGKey(0)
    kx, kp = jax.random.split(key)

    params = init_params(kp, NINPUT, NHIDDEN, NLAYER)

    src = jax.random.normal(kx, (SEQ, BATCH, NINPUT), jnp.float32)   # (S, B, D)
    attn_mask = jnp.zeros((SEQ, SEQ), jnp.float32)                   # additive mask
    # batch 0: full length; batch 1: last 3 positions are padding
    src_padding_mask = jnp.array(
        [[False] * SEQ,
         [False] * 5 + [True] * 3], dtype=bool)                      # (B, S)
    src_len = jnp.array([8.0, 5.0], jnp.float32)                     # (B,)

    pooled, attn = spatial_msm_forward(
        src, attn_mask, src_padding_mask, src_len, params, nhead=NHEAD)
    pooled = jax.block_until_ready(pooled)
    attn = jax.block_until_ready(attn)

    ref_pooled, ref_attn = reference_forward(
        src, attn_mask, src_padding_mask, src_len, params, NHEAD)

    assert pooled.shape == (BATCH, NINPUT)
    assert attn.shape == (BATCH, SEQ, SEQ)
    # kernel uses bf16 MXU operands (f32 accumulation) and an approx softmax
    # reciprocal; reference is pure f32 -> slightly relaxed tolerance.
    assert jnp.allclose(pooled, ref_pooled, atol=5e-2, rtol=5e-2), (
        float(jnp.max(jnp.abs(pooled - ref_pooled))))
    assert jnp.allclose(attn, ref_attn, atol=5e-2, rtol=5e-2), (
        float(jnp.max(jnp.abs(attn - ref_attn))))

    print("KERNEL_OK")
</pallas_src>

<mosaic_0001>
module attributes {stable_mosaic.version = 11 : i64} {
  func.func @spatial_msm_kernel(%arg0: i32, %arg1: memref<2x8x32xf32, #tpu.memory_space<vmem>>, %arg2: memref<2x8x8xf32, #tpu.memory_space<vmem>>, %arg3: memref<2x8x1xf32, #tpu.memory_space<vmem>>, %arg4: memref<8x32xf32, #tpu.memory_space<vmem>>, %arg5: memref<1x32x96xbf16, #tpu.memory_space<vmem>>, %arg6: memref<1x1x96xf32, #tpu.memory_space<vmem>>, %arg7: memref<1x32x32xbf16, #tpu.memory_space<vmem>>, %arg8: memref<1x1x32xf32, #tpu.memory_space<vmem>>, %arg9: memref<1x1x32xf32, #tpu.memory_space<vmem>>, %arg10: memref<1x1x32xf32, #tpu.memory_space<vmem>>, %arg11: memref<1x32x64xbf16, #tpu.memory_space<vmem>>, %arg12: memref<1x1x64xf32, #tpu.memory_space<vmem>>, %arg13: memref<1x64x32xbf16, #tpu.memory_space<vmem>>, %arg14: memref<1x1x32xf32, #tpu.memory_space<vmem>>, %arg15: memref<1x1x32xf32, #tpu.memory_space<vmem>>, %arg16: memref<1x1x32xf32, #tpu.memory_space<vmem>>, %arg17: memref<2x32xf32, #tpu.memory_space<vmem>>, %arg18: memref<2x8x8xf32, #tpu.memory_space<vmem>>, %arg19: memref<16x32xf32, #tpu.memory_space<vmem>>) attributes {dimension_semantics = [#tpu.dimension_semantics<arbitrary>], iteration_bounds = array<i64: 2>, scalar_prefetch = 0 : i64, scratch_operands = 1 : i64, tpu.core_type = #tpu.core_type<tc>, window_params = [{pipeline_mode = #tpu.pipeline_mode<synchronous>, transform_indices = @transform_0, window_bounds = array<i64: 2, 8, 32>}, {pipeline_mode = #tpu.pipeline_mode<synchronous>, transform_indices = @transform_1, window_bounds = array<i64: 2, 8, 8>}, {pipeline_mode = #tpu.pipeline_mode<synchronous>, transform_indices = @transform_2, window_bounds = array<i64: 2, 8, 1>}, {pipeline_mode = #tpu.pipeline_mode<synchronous>, transform_indices = @transform_3, window_bounds = array<i64: 8, 32>}, {transform_indices = @transform_4, window_bounds = array<i64: 1, 32, 96>}, {transform_indices = @transform_5, window_bounds = array<i64: 1, 1, 96>}, {transform_indices = @transform_6, window_bounds = array<i64: 1, 32, 32>}, {transform_indices = @transform_7, window_bounds = array<i64: 1, 1, 32>}, {transform_indices = @transform_8, window_bounds = array<i64: 1, 1, 32>}, {transform_indices = @transform_9, window_bounds = array<i64: 1, 1, 32>}, {transform_indices = @transform_10, window_bounds = array<i64: 1, 32, 64>}, {transform_indices = @transform_11, window_bounds = array<i64: 1, 1, 64>}, {transform_indices = @transform_12, window_bounds = array<i64: 1, 64, 32>}, {transform_indices = @transform_13, window_bounds = array<i64: 1, 1, 32>}, {transform_indices = @transform_14, window_bounds = array<i64: 1, 1, 32>}, {transform_indices = @transform_15, window_bounds = array<i64: 1, 1, 32>}, {pipeline_mode = #tpu.pipeline_mode<synchronous>, transform_indices = @transform_16, window_bounds = array<i64: 2, 32>}, {pipeline_mode = #tpu.pipeline_mode<synchronous>, transform_indices = @transform_17, window_bounds = array<i64: 2, 8, 8>}]} {
    %c0_i32 = arith.constant 0 : i32
    %0 = arith.cmpi eq, %arg0, %c0_i32 : i32
    %1 = arith.extui %0 : i1 to i32
    %c0_i32_0 = arith.constant 0 : i32
    %2 = arith.cmpi ne, %1, %c0_i32_0 : i32
    scf.if %2 {
      %c0_78 = arith.constant 0 : index
      %c0_79 = arith.constant 0 : index
      %c0_80 = arith.constant 0 : index
      %195 = vector.load %arg1[%c0_78, %c0_79, %c0_80] : memref<2x8x32xf32, #tpu.memory_space<vmem>>, vector<2x8x32xf32>
      %c0_81 = arith.constant 0 : index
      %c0_82 = arith.constant 0 : index
      %196 = vector.load %arg4[%c0_81, %c0_82] : memref<8x32xf32, #tpu.memory_space<vmem>>, vector<8x32xf32>
      %197 = vector.shape_cast %196 : vector<8x32xf32> to vector<1x8x32xf32>
      %198 = vector.broadcast %197 : vector<1x8x32xf32> to vector<2x8x32xf32>
      %199 = arith.addf %195, %198 : vector<2x8x32xf32>
      %200 = vector.shape_cast %199 : vector<2x8x32xf32> to vector<16x32xf32>
      %c0_83 = arith.constant 0 : index
      %c0_84 = arith.constant 0 : index
      %201 = vector.load %arg19[%c0_83, %c0_84] : memref<16x32xf32, #tpu.memory_space<vmem>>, vector<16x32xf32>
      tpu.vector_store %arg19[%c0_83, %c0_84], %200 {strides = array<i32>} : memref<16x32xf32, #tpu.memory_space<vmem>>, vector<16x32xf32>,
    } else {
    }
    %c0 = arith.constant 0 : index
    %c0_1 = arith.constant 0 : index
    %3 = vector.load %arg19[%c0, %c0_1] : memref<16x32xf32, #tpu.memory_space<vmem>>, vector<16x32xf32>
    %c0_2 = arith.constant 0 : index
    %c0_3 = arith.constant 0 : index
    %c0_4 = arith.constant 0 : index
    %4 = vector.load %arg2[%c0_2, %c0_3, %c0_4] : memref<2x8x8xf32, #tpu.memory_space<vmem>>, vector<2x8x8xf32>
    %5 = arith.truncf %3 : vector<16x32xf32> to vector<16x32xbf16>
    %c0_5 = arith.constant 0 : index
    %c0_6 = arith.constant 0 : index
    %c0_7 = arith.constant 0 : index
    %6 = vector.load %arg5[%c0_5, %c0_6, %c0_7] : memref<1x32x96xbf16, #tpu.memory_space<vmem>>, vector<1x32x96xbf16>
    %7 = vector.shape_cast %6 : vector<1x32x96xbf16> to vector<32x96xbf16>
    %cst = arith.constant dense<0.000000e+00> : vector<16x96xf32>
    %8 = tpu.matmul %5, %7, %cst {dimension_numbers = #tpu.dot_dimension_numbers<[1], [0], [0], [1], [0, 0, 1, 1], [], []>} : vector<16x32xbf16>, vector<32x96xbf16>, vector<16x96xf32> -> vector<16x96xf32>
    %c0_8 = arith.constant 0 : index
    %c0_9 = arith.constant 0 : index
    %c0_10 = arith.constant 0 : index
    %9 = vector.load %arg6[%c0_8, %c0_9, %c0_10] : memref<1x1x96xf32, #tpu.memory_space<vmem>>, vector<1x1x96xf32>
    %10 = vector.shape_cast %9 : vector<1x1x96xf32> to vector<1x96xf32>
    %11 = vector.broadcast %10 : vector<1x96xf32> to vector<16x96xf32>
    %12 = arith.addf %8, %11 : vector<16x96xf32>
    %13 = vector.extract_strided_slice %12 {offsets = [0, 0], sizes = [16, 32], strides = [1, 1]} : vector<16x96xf32> to vector<16x32xf32>
    %cst_11 = arith.constant 0.353553385 : f32
    %14 = vector.broadcast %cst_11 : f32 to vector<16x32xf32>
    %15 = arith.mulf %13, %14 : vector<16x32xf32>
    %16 = arith.truncf %15 : vector<16x32xf32> to vector<16x32xbf16>
    %17 = vector.extract_strided_slice %12 {offsets = [0, 32], sizes = [16, 32], strides = [1, 1]} : vector<16x96xf32> to vector<16x32xf32>
    %18 = arith.truncf %17 : vector<16x32xf32> to vector<16x32xbf16>
    %19 = vector.extract_strided_slice %12 {offsets = [0, 64], sizes = [16, 32], strides = [1, 1]} : vector<16x96xf32> to vector<16x32xf32>
    %20 = arith.truncf %19 : vector<16x32xf32> to vector<16x32xbf16>
    %cst_12 = arith.constant 0.000000e+00 : f32
    %21 = vector.broadcast %cst_12 : f32 to vector<2x8x8xf32>
    %22 = vector.extract_strided_slice %16 {offsets = [0, 0], sizes = [16, 8], strides = [1, 1]} : vector<16x32xbf16> to vector<16x8xbf16>
    %23 = vector.shape_cast %22 : vector<16x8xbf16> to vector<2x8x8xbf16>
    %24 = vector.extract_strided_slice %18 {offsets = [0, 0], sizes = [16, 8], strides = [1, 1]} : vector<16x32xbf16> to vector<16x8xbf16>
    %25 = vector.shape_cast %24 : vector<16x8xbf16> to vector<2x8x8xbf16>
    %26 = vector.extract_strided_slice %20 {offsets = [0, 0], sizes = [16, 8], strides = [1, 1]} : vector<16x32xbf16> to vector<16x8xbf16>
    %27 = vector.shape_cast %26 : vector<16x8xbf16> to vector<2x8x8xbf16>
    "tpu.trace_start"() <{level = 10 : i32, message = "bqd,bkd->bqk"}> : () -> ()
    %cst_13 = arith.constant dense<0.000000e+00> : vector<2x8x8xf32>
    %28 = tpu.matmul %23, %25, %cst_13 {dimension_numbers = #tpu.dot_dimension_numbers<[2], [2], [1], [1], [0, 0, 0, 1, 1, 1], [0], [0]>} : vector<2x8x8xbf16>, vector<2x8x8xbf16>, vector<2x8x8xf32> -> vector<2x8x8xf32>
    "tpu.trace_stop"() : () -> ()
    %29 = arith.addf %28, %4 : vector<2x8x8xf32>
    %cst_14 = arith.constant dense<0xFF800000> : vector<2x8xf32>
    %30 = vector.multi_reduction <maximumf>, %29, %cst_14 [2] : vector<2x8x8xf32> to vector<2x8xf32>
    %31 = vector.shape_cast %30 : vector<2x8xf32> to vector<2x8x1xf32>
    %32 = vector.broadcast %31 : vector<2x8x1xf32> to vector<2x8x8xf32>
    %33 = arith.subf %29, %32 : vector<2x8x8xf32>
    %34 = math.exp %33 : vector<2x8x8xf32>
    %cst_15 = arith.constant dense<0.000000e+00> : vector<2x8xf32>
    %35 = vector.multi_reduction <add>, %34, %cst_15 [2] : vector<2x8x8xf32> to vector<2x8xf32>
    %36 = vector.shape_cast %35 : vector<2x8xf32> to vector<2x8x1xf32>
    %37 = tpu.reciprocal %36 {approx = true} : vector<2x8x1xf32> -> vector<2x8x1xf32>
    %38 = vector.broadcast %37 : vector<2x8x1xf32> to vector<2x8x8xf32>
    %39 = arith.mulf %34, %38 : vector<2x8x8xf32>
    %40 = arith.addf %21, %39 : vector<2x8x8xf32>
    %41 = arith.truncf %39 : vector<2x8x8xf32> to vector<2x8x8xbf16>
    "tpu.trace_start"() <{level = 10 : i32, message = "bqk,bkd->bqd"}> : () -> ()
    %cst_16 = arith.constant dense<0.000000e+00> : vector<2x8x8xf32>
    %42 = tpu.matmul %41, %27, %cst_16 {dimension_numbers = #tpu.dot_dimension_numbers<[2], [1], [1], [2], [0, 0, 0, 1, 1, 2], [0], [0]>} : vector<2x8x8xbf16>, vector<2x8x8xbf16>, vector<2x8x8xf32> -> vector<2x8x8xf32>
    "tpu.trace_stop"() : () -> ()
    %43 = vector.extract_strided_slice %16 {offsets = [0, 8], sizes = [16, 8], strides = [1, 1]} : vector<16x32xbf16> to vector<16x8xbf16>
    %44 = vector.shape_cast %43 : vector<16x8xbf16> to vector<2x8x8xbf16>
    %45 = vector.extract_strided_slice %18 {offsets = [0, 8], sizes = [16, 8], strides = [1, 1]} : vector<16x32xbf16> to vector<16x8xbf16>
    %46 = vector.shape_cast %45 : vector<16x8xbf16> to vector<2x8x8xbf16>
    %47 = vector.extract_strided_slice %20 {offsets = [0, 8], sizes = [16, 8], strides = [1, 1]} : vector<16x32xbf16> to vector<16x8xbf16>
    %48 = vector.shape_cast %47 : vector<16x8xbf16> to vector<2x8x8xbf16>
    "tpu.trace_start"() <{level = 10 : i32, message = "bqd,bkd->bqk"}> : () -> ()
    %cst_17 = arith.constant dense<0.000000e+00> : vector<2x8x8xf32>
    %49 = tpu.matmul %44, %46, %cst_17 {dimension_numbers = #tpu.dot_dimension_numbers<[2], [2], [1], [1], [0, 0, 0, 1, 1, 1], [0], [0]>} : vector<2x8x8xbf16>, vector<2x8x8xbf16>, vector<2x8x8xf32> -> vector<2x8x8xf32>
    "tpu.trace_stop"() : () -> ()
    %50 = arith.addf %49, %4 : vector<2x8x8xf32>
    %cst_18 = arith.constant dense<0xFF800000> : vector<2x8xf32>
    %51 = vector.multi_reduction <maximumf>, %50, %cst_18 [2] : vector<2x8x8xf32> to vector<2x8xf32>
    %52 = vector.shape_cast %51 : vector<2x8xf32> to vector<2x8x1xf32>
    %53 = vector.broadcast %52 : vector<2x8x1xf32> to vector<2x8x8xf32>
    %54 = arith.subf %50, %53 : vector<2x8x8xf32>
    %55 = math.exp %54 : vector<2x8x8xf32>
    %cst_19 = arith.constant dense<0.000000e+00> : vector<2x8xf32>
    %56 = vector.multi_reduction <add>, %55, %cst_19 [2] : vector<2x8x8xf32> to vector<2x8xf32>
    %57 = vector.shape_cast %56 : vector<2x8xf32> to vector<2x8x1xf32>
    %58 = tpu.reciprocal %57 {approx = true} : vector<2x8x1xf32> -> vector<2x8x1xf32>
    %59 = vector.broadcast %58 : vector<2x8x1xf32> to vector<2x8x8xf32>
    %60 = arith.mulf %55, %59 : vector<2x8x8xf32>
    %61 = arith.addf %40, %60 : vector<2x8x8xf32>
    %62 = arith.truncf %60 : vector<2x8x8xf32> to vector<2x8x8xbf16>
    "tpu.trace_start"() <{level = 10 : i32, message = "bqk,bkd->bqd"}> : () -> ()
    %cst_20 = arith.constant dense<0.000000e+00> : vector<2x8x8xf32>
    %63 = tpu.matmul %62, %48, %cst_20 {dimension_numbers = #tpu.dot_dimension_numbers<[2], [1], [1], [2], [0, 0, 0, 1, 1, 2], [0], [0]>} : vector<2x8x8xbf16>, vector<2x8x8xbf16>, vector<2x8x8xf32> -> vector<2x8x8xf32>
    "tpu.trace_stop"() : () -> ()
    %64 = vector.extract_strided_slice %16 {offsets = [0, 16], sizes = [16, 8], strides = [1, 1]} : vector<16x32xbf16> to vector<16x8xbf16>
    %65 = vector.shape_cast %64 : vector<16x8xbf16> to vector<2x8x8xbf16>
    %66 = vector.extract_strided_slice %18 {offsets = [0, 16], sizes = [16, 8], strides = [1, 1]} : vector<16x32xbf16> to vector<16x8xbf16>
    %67 = vector.shape_cast %66 : vector<16x8xbf16> to vector<2x8x8xbf16>
    %68 = vector.extract_strided_slice %20 {offsets = [0, 16], sizes = [16, 8], strides = [1, 1]} : vector<16x32xbf16> to vector<16x8xbf16>
    %69 = vector.shape_cast %68 : vector<16x8xbf16> to vector<2x8x8xbf16>
    "tpu.trace_start"() <{level = 10 : i32, message = "bqd,bkd->bqk"}> : () -> ()
    %cst_21 = arith.constant dense<0.000000e+00> : vector<2x8x8xf32>
    %70 = tpu.matmul %65, %67, %cst_21 {dimension_numbers = #tpu.dot_dimension_numbers<[2], [2], [1], [1], [0, 0, 0, 1, 1, 1], [0], [0]>} : vector<2x8x8xbf16>, vector<2x8x8xbf16>, vector<2x8x8xf32> -> vector<2x8x8xf32>
    "tpu.trace_stop"() : () -> ()
    %71 = arith.addf %70, %4 : vector<2x8x8xf32>
    %cst_22 = arith.constant dense<0xFF800000> : vector<2x8xf32>
    %72 = vector.multi_reduction <maximumf>, %71, %cst_22 [2] : vector<2x8x8xf32> to vector<2x8xf32>
    %73 = vector.shape_cast %72 : vector<2x8xf32> to vector<2x8x1xf32>
    %74 = vector.broadcast %73 : vector<2x8x1xf32> to vector<2x8x8xf32>
    %75 = arith.subf %71, %74 : vector<2x8x8xf32>
    %76 = math.exp %75 : vector<2x8x8xf32>
    %cst_23 = arith.constant dense<0.000000e+00> : vector<2x8xf32>
    %77 = vector.multi_reduction <add>, %76, %cst_23 [2] : vector<2x8x8xf32> to vector<2x8xf32>
    %78 = vector.shape_cast %77 : vector<2x8xf32> to vector<2x8x1xf32>
    %79 = tpu.reciprocal %78 {approx = true} : vector<2x8x1xf32> -> vector<2x8x1xf32>
    %80 = vector.broadcast %79 : vector<2x8x1xf32> to vector<2x8x8xf32>
    %81 = arith.mulf %76, %80 : vector<2x8x8xf32>
    %82 = arith.addf %61, %81 : vector<2x8x8xf32>
    %83 = arith.truncf %81 : vector<2x8x8xf32> to vector<2x8x8xbf16>
    "tpu.trace_start"() <{level = 10 : i32, message = "bqk,bkd->bqd"}> : () -> ()
    %cst_24 = arith.constant dense<0.000000e+00> : vector<2x8x8xf32>
    %84 = tpu.matmul %83, %69, %cst_24 {dimension_numbers = #tpu.dot_dimension_numbers<[2], [1], [1], [2], [0, 0, 0, 1, 1, 2], [0], [0]>} : vector<2x8x8xbf16>, vector<2x8x8xbf16>, vector<2x8x8xf32> -> vector<2x8x8xf32>
    "tpu.trace_stop"() : () -> ()
    %85 = vector.extract_strided_slice %16 {offsets = [0, 24], sizes = [16, 8], strides = [1, 1]} : vector<16x32xbf16> to vector<16x8xbf16>
    %86 = vector.shape_cast %85 : vector<16x8xbf16> to vector<2x8x8xbf16>
    %87 = vector.extract_strided_slice %18 {offsets = [0, 24], sizes = [16, 8], strides = [1, 1]} : vector<16x32xbf16> to vector<16x8xbf16>
    %88 = vector.shape_cast %87 : vector<16x8xbf16> to vector<2x8x8xbf16>
    %89 = vector.extract_strided_slice %20 {offsets = [0, 24], sizes = [16, 8], strides = [1, 1]} : vector<16x32xbf16> to vector<16x8xbf16>
    %90 = vector.shape_cast %89 : vector<16x8xbf16> to vector<2x8x8xbf16>
    "tpu.trace_start"() <{level = 10 : i32, message = "bqd,bkd->bqk"}> : () -> ()
    %cst_25 = arith.constant dense<0.000000e+00> : vector<2x8x8xf32>
    %91 = tpu.matmul %86, %88, %cst_25 {dimension_numbers = #tpu.dot_dimension_numbers<[2], [2], [1], [1], [0, 0, 0, 1, 1, 1], [0], [0]>} : vector<2x8x8xbf16>, vector<2x8x8xbf16>, vector<2x8x8xf32> -> vector<2x8x8xf32>
    "tpu.trace_stop"() : () -> ()
    %92 = arith.addf %91, %4 : vector<2x8x8xf32>
    %cst_26 = arith.constant dense<0xFF800000> : vector<2x8xf32>
    %93 = vector.multi_reduction <maximumf>, %92, %cst_26 [2] : vector<2x8x8xf32> to vector<2x8xf32>
    %94 = vector.shape_cast %93 : vector<2x8xf32> to vector<2x8x1xf32>
    %95 = vector.broadcast %94 : vector<2x8x1xf32> to vector<2x8x8xf32>
    %96 = arith.subf %92, %95 : vector<2x8x8xf32>
    %97 = math.exp %96 : vector<2x8x8xf32>
    %cst_27 = arith.constant dense<0.000000e+00> : vector<2x8xf32>
    %98 = vector.multi_reduction <add>, %97, %cst_27 [2] : vector<2x8x8xf32> to vector<2x8xf32>
    %99 = vector.shape_cast %98 : vector<2x8xf32> to vector<2x8x1xf32>
    %100 = tpu.reciprocal %99 {approx = true} : vector<2x8x1xf32> -> vector<2x8x1xf32>
    %101 = vector.broadcast %100 : vector<2x8x1xf32> to vector<2x8x8xf32>
    %102 = arith.mulf %97, %101 : vector<2x8x8xf32>
    %103 = arith.addf %82, %102 : vector<2x8x8xf32>
    %104 = arith.truncf %102 : vector<2x8x8xf32> to vector<2x8x8xbf16>
    "tpu.trace_start"() <{level = 10 : i32, message = "bqk,bkd->bqd"}> : () -> ()
    %cst_28 = arith.constant dense<0.000000e+00> : vector<2x8x8xf32>
    %105 = tpu.matmul %104, %90, %cst_28 {dimension_numbers = #tpu.dot_dimension_numbers<[2], [1], [1], [2], [0, 0, 0, 1, 1, 2], [0], [0]>} : vector<2x8x8xbf16>, vector<2x8x8xbf16>, vector<2x8x8xf32> -> vector<2x8x8xf32>
    %c1_i32 = arith.constant 1 : i32
    "tpu.trace_stop"() : () -> ()
    %106 = arith.cmpi eq, %arg0, %c1_i32 : i32
    %107 = arith.extui %106 : i1 to i32
    %c0_i32_29 = arith.constant 0 : i32
    %108 = arith.cmpi ne, %107, %c0_i32_29 : i32
    scf.if %108 {
      %cst_78 = arith.constant 2.500000e-01 : f32
      %195 = vector.broadcast %cst_78 : f32 to vector<2x8x8xf32>
      %196 = arith.mulf %103, %195 : vector<2x8x8xf32>
      %c0_79 = arith.constant 0 : index
      %c0_80 = arith.constant 0 : index
      %c0_81 = arith.constant 0 : index
      %197 = vector.load %arg18[%c0_79, %c0_80, %c0_81] : memref<2x8x8xf32, #tpu.memory_space<vmem>>, vector<2x8x8xf32>
      tpu.vector_store %arg18[%c0_79, %c0_80, %c0_81], %196 {strides = array<i32>} : memref<2x8x8xf32, #tpu.memory_space<vmem>>, vector<2x8x8xf32>,
    } else {
    }
    %109 = tpu.concatenate %42, %63, %84, %105 in 2 : vector<2x8x8xf32>, vector<2x8x8xf32>, vector<2x8x8xf32>, vector<2x8x8xf32> -> vector<2x8x32xf32>
    %110 = vector.shape_cast %109 : vector<2x8x32xf32> to vector<16x32xf32>
    %111 = arith.truncf %110 : vector<16x32xf32> to vector<16x32xbf16>
    %c0_30 = arith.constant 0 : index
    %c0_31 = arith.constant 0 : index
    %c0_32 = arith.constant 0 : index
    %112 = vector.load %arg7[%c0_30, %c0_31, %c0_32] : memref<1x32x32xbf16, #tpu.memory_space<vmem>>, vector<1x32x32xbf16>
    %113 = vector.shape_cast %112 : vector<1x32x32xbf16> to vector<32x32xbf16>
    %cst_33 = arith.constant dense<0.000000e+00> : vector<16x32xf32>
    %114 = tpu.matmul %111, %113, %cst_33 {dimension_numbers = #tpu.dot_dimension_numbers<[1], [0], [0], [1], [0, 0, 1, 1], [], []>} : vector<16x32xbf16>, vector<32x32xbf16>, vector<16x32xf32> -> vector<16x32xf32>
    %c0_34 = arith.constant 0 : index
    %c0_35 = arith.constant 0 : index
    %c0_36 = arith.constant 0 : index
    %115 = vector.load %arg8[%c0_34, %c0_35, %c0_36] : memref<1x1x32xf32, #tpu.memory_space<vmem>>, vector<1x1x32xf32>
    %116 = vector.shape_cast %115 : vector<1x1x32xf32> to vector<1x32xf32>
    %117 = vector.broadcast %116 : vector<1x32xf32> to vector<16x32xf32>
    %118 = arith.addf %114, %117 : vector<16x32xf32>
    %119 = arith.addf %3, %118 : vector<16x32xf32>
    %c0_37 = arith.constant 0 : index
    %c0_38 = arith.constant 0 : index
    %c0_39 = arith.constant 0 : index
    %120 = vector.load %arg9[%c0_37, %c0_38, %c0_39] : memref<1x1x32xf32, #tpu.memory_space<vmem>>, vector<1x1x32xf32>
    %121 = vector.shape_cast %120 : vector<1x1x32xf32> to vector<1x32xf32>
    %c0_40 = arith.constant 0 : index
    %c0_41 = arith.constant 0 : index
    %c0_42 = arith.constant 0 : index
    %122 = vector.load %arg10[%c0_40, %c0_41, %c0_42] : memref<1x1x32xf32, #tpu.memory_space<vmem>>, vector<1x1x32xf32>
    %123 = vector.shape_cast %122 : vector<1x1x32xf32> to vector<1x32xf32>
    %cst_43 = arith.constant dense<0.000000e+00> : vector<16xf32>
    %124 = vector.multi_reduction <add>, %119, %cst_43 [1] : vector<16x32xf32> to vector<16xf32>
    %125 = vector.shape_cast %124 : vector<16xf32> to vector<16x1xf32>
    %cst_44 = arith.constant 3.200000e+01 : f32
    %126 = vector.broadcast %cst_44 : f32 to vector<16x1xf32>
    %127 = arith.divf %125, %126 : vector<16x1xf32>
    %128 = vector.broadcast %127 : vector<16x1xf32> to vector<16x32xf32>
    %129 = arith.subf %119, %128 : vector<16x32xf32>
    %130 = arith.mulf %129, %129 : vector<16x32xf32>
    %cst_45 = arith.constant dense<0.000000e+00> : vector<16xf32>
    %131 = vector.multi_reduction <add>, %130, %cst_45 [1] : vector<16x32xf32> to vector<16xf32>
    %132 = vector.shape_cast %131 : vector<16xf32> to vector<16x1xf32>
    %cst_46 = arith.constant 3.200000e+01 : f32
    %133 = vector.broadcast %cst_46 : f32 to vector<16x1xf32>
    %134 = arith.divf %132, %133 : vector<16x1xf32>
    %135 = vector.broadcast %127 : vector<16x1xf32> to vector<16x32xf32>
    %136 = arith.subf %119, %135 : vector<16x32xf32>
    %cst_47 = arith.constant 9.99999974E-6 : f32
    %137 = vector.broadcast %cst_47 : f32 to vector<16x1xf32>
    %138 = arith.addf %134, %137 : vector<16x1xf32>
    %139 = math.rsqrt %138 : vector<16x1xf32>
    %140 = vector.broadcast %139 : vector<16x1xf32> to vector<16x32xf32>
    %141 = arith.mulf %136, %140 : vector<16x32xf32>
    %142 = vector.broadcast %121 : vector<1x32xf32> to vector<16x32xf32>
    %143 = arith.mulf %141, %142 : vector<16x32xf32>
    %144 = vector.broadcast %123 : vector<1x32xf32> to vector<16x32xf32>
    %145 = arith.addf %143, %144 : vector<16x32xf32>
    %146 = arith.truncf %145 : vector<16x32xf32> to vector<16x32xbf16>
    %c0_48 = arith.constant 0 : index
    %c0_49 = arith.constant 0 : index
    %c0_50 = arith.constant 0 : index
    %147 = vector.load %arg11[%c0_48, %c0_49, %c0_50] : memref<1x32x64xbf16, #tpu.memory_space<vmem>>, vector<1x32x64xbf16>
    %148 = vector.shape_cast %147 : vector<1x32x64xbf16> to vector<32x64xbf16>
    %cst_51 = arith.constant dense<0.000000e+00> : vector<16x64xf32>
    %149 = tpu.matmul %146, %148, %cst_51 {dimension_numbers = #tpu.dot_dimension_numbers<[1], [0], [0], [1], [0, 0, 1, 1], [], []>} : vector<16x32xbf16>, vector<32x64xbf16>, vector<16x64xf32> -> vector<16x64xf32>
    %c0_52 = arith.constant 0 : index
    %c0_53 = arith.constant 0 : index
    %c0_54 = arith.constant 0 : index
    %150 = vector.load %arg12[%c0_52, %c0_53, %c0_54] : memref<1x1x64xf32, #tpu.memory_space<vmem>>, vector<1x1x64xf32>
    %151 = vector.shape_cast %150 : vector<1x1x64xf32> to vector<1x64xf32>
    %152 = vector.broadcast %151 : vector<1x64xf32> to vector<16x64xf32>
    %153 = arith.addf %149, %152 : vector<16x64xf32>
    %cst_55 = arith.constant 0.000000e+00 : f32
    %154 = vector.broadcast %cst_55 : f32 to vector<16x64xf32>
    %155 = arith.maximumf %153, %154 : vector<16x64xf32>
    %156 = arith.truncf %155 : vector<16x64xf32> to vector<16x64xbf16>
    %c0_56 = arith.constant 0 : index
    %c0_57 = arith.constant 0 : index
    %c0_58 = arith.constant 0 : index
    %157 = vector.load %arg13[%c0_56, %c0_57, %c0_58] : memref<1x64x32xbf16, #tpu.memory_space<vmem>>, vector<1x64x32xbf16>
    %158 = vector.shape_cast %157 : vector<1x64x32xbf16> to vector<64x32xbf16>
    %cst_59 = arith.constant dense<0.000000e+00> : vector<16x32xf32>
    %159 = tpu.matmul %156, %158, %cst_59 {dimension_numbers = #tpu.dot_dimension_numbers<[1], [0], [0], [1], [0, 0, 1, 1], [], []>} : vector<16x64xbf16>, vector<64x32xbf16>, vector<16x32xf32> -> vector<16x32xf32>
    %c0_60 = arith.constant 0 : index
    %c0_61 = arith.constant 0 : index
    %c0_62 = arith.constant 0 : index
    %160 = vector.load %arg14[%c0_60, %c0_61, %c0_62] : memref<1x1x32xf32, #tpu.memory_space<vmem>>, vector<1x1x32xf32>
    %161 = vector.shape_cast %160 : vector<1x1x32xf32> to vector<1x32xf32>
    %162 = vector.broadcast %161 : vector<1x32xf32> to vector<16x32xf32>
    %163 = arith.addf %159, %162 : vector<16x32xf32>
    %164 = arith.addf %145, %163 : vector<16x32xf32>
    %c0_63 = arith.constant 0 : index
    %c0_64 = arith.constant 0 : index
    %c0_65 = arith.constant 0 : index
    %165 = vector.load %arg15[%c0_63, %c0_64, %c0_65] : memref<1x1x32xf32, #tpu.memory_space<vmem>>, vector<1x1x32xf32>
    %166 = vector.shape_cast %165 : vector<1x1x32xf32> to vector<1x32xf32>
    %c0_66 = arith.constant 0 : index
    %c0_67 = arith.constant 0 : index
    %c0_68 = arith.constant 0 : index
    %167 = vector.load %arg16[%c0_66, %c0_67, %c0_68] : memref<1x1x32xf32, #tpu.memory_space<vmem>>, vector<1x1x32xf32>
    %168 = vector.shape_cast %167 : vector<1x1x32xf32> to vector<1x32xf32>
    %cst_69 = arith.constant dense<0.000000e+00> : vector<16xf32>
    %169 = vector.multi_reduction <add>, %164, %cst_69 [1] : vector<16x32xf32> to vector<16xf32>
    %170 = vector.shape_cast %169 : vector<16xf32> to vector<16x1xf32>
    %cst_70 = arith.constant 3.200000e+01 : f32
    %171 = vector.broadcast %cst_70 : f32 to vector<16x1xf32>
    %172 = arith.divf %170, %171 : vector<16x1xf32>
    %173 = vector.broadcast %172 : vector<16x1xf32> to vector<16x32xf32>
    %174 = arith.subf %164, %173 : vector<16x32xf32>
    %175 = arith.mulf %174, %174 : vector<16x32xf32>
    %cst_71 = arith.constant dense<0.000000e+00> : vector<16xf32>
    %176 = vector.multi_reduction <add>, %175, %cst_71 [1] : vector<16x32xf32> to vector<16xf32>
    %177 = vector.shape_cast %176 : vector<16xf32> to vector<16x1xf32>
    %cst_72 = arith.constant 3.200000e+01 : f32
    %178 = vector.broadcast %cst_72 : f32 to vector<16x1xf32>
    %179 = arith.divf %177, %178 : vector<16x1xf32>
    %180 = vector.broadcast %172 : vector<16x1xf32> to vector<16x32xf32>
    %181 = arith.subf %164, %180 : vector<16x32xf32>
    %cst_73 = arith.constant 9.99999974E-6 : f32
    %182 = vector.broadcast %cst_73 : f32 to vector<16x1xf32>
    %183 = arith.addf %179, %182 : vector<16x1xf32>
    %184 = math.rsqrt %183 : vector<16x1xf32>
    %185 = vector.broadcast %184 : vector<16x1xf32> to vector<16x32xf32>
    %186 = arith.mulf %181, %185 : vector<16x32xf32>
    %187 = vector.broadcast %166 : vector<1x32xf32> to vector<16x32xf32>
    %188 = arith.mulf %186, %187 : vector<16x32xf32>
    %189 = vector.broadcast %168 : vector<1x32xf32> to vector<16x32xf32>
    %190 = arith.addf %188, %189 : vector<16x32xf32>
    %c0_74 = arith.constant 0 : index
    %c0_75 = arith.constant 0 : index
    %191 = vector.load %arg19[%c0_74, %c0_75] : memref<16x32xf32, #tpu.memory_space<vmem>>, vector<16x32xf32>
    tpu.vector_store %arg19[%c0_74, %c0_75], %190 {strides = array<i32>} : memref<16x32xf32, #tpu.memory_space<vmem>>, vector<16x32xf32>,
    %c1_i32_76 = arith.constant 1 : i32
    %192 = arith.cmpi eq, %arg0, %c1_i32_76 : i32
    %193 = arith.extui %192 : i1 to i32
    %c0_i32_77 = arith.constant 0 : i32
    %194 = arith.cmpi ne, %193, %c0_i32_77 : i32
    scf.if %194 {
      %195 = vector.shape_cast %190 : vector<16x32xf32> to vector<2x8x32xf32>
      %c0_78 = arith.constant 0 : index
      %c0_79 = arith.constant 0 : index
      %c0_80 = arith.constant 0 : index
      %196 = vector.load %arg3[%c0_78, %c0_79, %c0_80] : memref<2x8x1xf32, #tpu.memory_space<vmem>>, vector<2x8x1xf32>
      %197 = vector.broadcast %196 : vector<2x8x1xf32> to vector<2x8x32xf32>
      %198 = arith.mulf %195, %197 : vector<2x8x32xf32>
      %cst_81 = arith.constant dense<0.000000e+00> : vector<2x32xf32>
      %199 = vector.multi_reduction <add>, %198, %cst_81 [1] : vector<2x8x32xf32> to vector<2x32xf32>
      %c0_82 = arith.constant 0 : index
      %c0_83 = arith.constant 0 : index
      %200 = vector.load %arg17[%c0_82, %c0_83] : memref<2x32xf32, #tpu.memory_space<vmem>>, vector<2x32xf32>
      tpu.vector_store %arg17[%c0_82, %c0_83], %199 {strides = array<i32>} : memref<2x32xf32, #tpu.memory_space<vmem>>, vector<2x32xf32>,
    } else {
    }
    return
  }
  func.func @transform_0(%arg0: i32) -> (i32, i32, i32) {
    %c0_i32 = arith.constant 0 : i32
    %c0_i32_0 = arith.constant 0 : i32
    %c0_i32_1 = arith.constant 0 : i32
    %c0_i32_2 = arith.constant 0 : i32
    return %c0_i32, %c0_i32_0, %c0_i32_1 : i32, i32, i32
  }
  func.func @transform_1(%arg0: i32) -> (i32, i32, i32) {
    %c0_i32 = arith.constant 0 : i32
    %c0_i32_0 = arith.constant 0 : i32
    %c0_i32_1 = arith.constant 0 : i32
    %c0_i32_2 = arith.constant 0 : i32
    return %c0_i32, %c0_i32_0, %c0_i32_1 : i32, i32, i32
  }
  func.func @transform_2(%arg0: i32) -> (i32, i32, i32) {
    %c0_i32 = arith.constant 0 : i32
    %c0_i32_0 = arith.constant 0 : i32
    %c0_i32_1 = arith.constant 0 : i32
    %c0_i32_2 = arith.constant 0 : i32
    return %c0_i32, %c0_i32_0, %c0_i32_1 : i32, i32, i32
  }
  func.func @transform_3(%arg0: i32) -> (i32, i32) {
    %c0_i32 = arith.constant 0 : i32
    %c0_i32_0 = arith.constant 0 : i32
    %c0_i32_1 = arith.constant 0 : i32
    return %c0_i32, %c0_i32_0 : i32, i32
  }
  func.func @transform_4(%arg0: i32) -> (i32, i32, i32) {
    %c0_i32 = arith.constant 0 : i32
    %c0_i32_0 = arith.constant 0 : i32
    %c0_i32_1 = arith.constant 0 : i32
    return %arg0, %c0_i32, %c0_i32_0 : i32, i32, i32
  }
  func.func @transform_5(%arg0: i32) -> (i32, i32, i32) {
    %c0_i32 = arith.constant 0 : i32
    %c0_i32_0 = arith.constant 0 : i32
    %c0_i32_1 = arith.constant 0 : i32
    return %arg0, %c0_i32, %c0_i32_0 : i32, i32, i32
  }
  func.func @transform_6(%arg0: i32) -> (i32, i32, i32) {
    %c0_i32 = arith.constant 0 : i32
    %c0_i32_0 = arith.constant 0 : i32
    %c0_i32_1 = arith.constant 0 : i32
    return %arg0, %c0_i32, %c0_i32_0 : i32, i32, i32
  }
  func.func @transform_7(%arg0: i32) -> (i32, i32, i32) {
    %c0_i32 = arith.constant 0 : i32
    %c0_i32_0 = arith.constant 0 : i32
    %c0_i32_1 = arith.constant 0 : i32
    return %arg0, %c0_i32, %c0_i32_0 : i32, i32, i32
  }
  func.func @transform_8(%arg0: i32) -> (i32, i32, i32) {
    %c0_i32 = arith.constant 0 : i32
    %c0_i32_0 = arith.constant 0 : i32
    %c0_i32_1 = arith.constant 0 : i32
    return %arg0, %c0_i32, %c0_i32_0 : i32, i32, i32
  }
  func.func @transform_9(%arg0: i32) -> (i32, i32, i32) {
    %c0_i32 = arith.constant 0 : i32
    %c0_i32_0 = arith.constant 0 : i32
    %c0_i32_1 = arith.constant 0 : i32
    return %arg0, %c0_i32, %c0_i32_0 : i32, i32, i32
  }
  func.func @transform_10(%arg0: i32) -> (i32, i32, i32) {
    %c0_i32 = arith.constant 0 : i32
    %c0_i32_0 = arith.constant 0 : i32
    %c0_i32_1 = arith.constant 0 : i32
    return %arg0, %c0_i32, %c0_i32_0 : i32, i32, i32
  }
  func.func @transform_11(%arg0: i32) -> (i32, i32, i32) {
    %c0_i32 = arith.constant 0 : i32
    %c0_i32_0 = arith.constant 0 : i32
    %c0_i32_1 = arith.constant 0 : i32
    return %arg0, %c0_i32, %c0_i32_0 : i32, i32, i32
  }
  func.func @transform_12(%arg0: i32) -> (i32, i32, i32) {
    %c0_i32 = arith.constant 0 : i32
    %c0_i32_0 = arith.constant 0 : i32
    %c0_i32_1 = arith.constant 0 : i32
    return %arg0, %c0_i32, %c0_i32_0 : i32, i32, i32
  }
  func.func @transform_13(%arg0: i32) -> (i32, i32, i32) {
    %c0_i32 = arith.constant 0 : i32
    %c0_i32_0 = arith.constant 0 : i32
    %c0_i32_1 = arith.constant 0 : i32
    return %arg0, %c0_i32, %c0_i32_0 : i32, i32, i32
  }
  func.func @transform_14(%arg0: i32) -> (i32, i32, i32) {
    %c0_i32 = arith.constant 0 : i32
    %c0_i32_0 = arith.constant 0 : i32
    %c0_i32_1 = arith.constant 0 : i32
    return %arg0, %c0_i32, %c0_i32_0 : i32, i32, i32
  }
  func.func @transform_15(%arg0: i32) -> (i32, i32, i32) {
    %c0_i32 = arith.constant 0 : i32
    %c0_i32_0 = arith.constant 0 : i32
    %c0_i32_1 = arith.constant 0 : i32
    return %arg0, %c0_i32, %c0_i32_0 : i32, i32, i32
  }
  func.func @transform_16(%arg0: i32) -> (i32, i32) {
    %c0_i32 = arith.constant 0 : i32
    %c0_i32_0 = arith.constant 0 : i32
    %c0_i32_1 = arith.constant 0 : i32
    return %c0_i32, %c0_i32_0 : i32, i32
  }
  func.func @transform_17(%arg0: i32) -> (i32, i32, i32) {
    %c0_i32 = arith.constant 0 : i32
    %c0_i32_0 = arith.constant 0 : i32
    %c0_i32_1 = arith.constant 0 : i32
    %c0_i32_2 = arith.constant 0 : i32
    return %c0_i32, %c0_i32_0, %c0_i32_1 : i32, i32, i32
  }
}

</mosaic_0001>

<bundles_post_ra>
// kernel: spatial_msm_forward.1
= control target key start
LH: loop header
LB: loop body
LE: loop exit
PB: predicated region body
PF: predicated region fallthrough
CT: control target
= control target key end

     0   :  { %s3219_s0 = inlined_call_operand.vmem [shape: f32[2,8,32], index: 0, kind: input, shape index: {}]   ;;  %s3220_s1 = inlined_call_operand.vmem [shape: f32[2,8,8], index: 1, kind: input, shape index: {}]   ;;  %s3221_s2 = inlined_call_operand.vmem [shape: f32[2,8,1], index: 2, kind: input, shape index: {}]   ;;  %s3222_s3 = inlined_call_operand.vmem [shape: f32[8,32], index: 3, kind: input, shape index: {}]   ;;  %s3223_s4 = inlined_call_operand.vmem [shape: bf16[2,32,96], index: 4, kind: input, shape index: {}]   ;;  %s3224_s5 = inlined_call_operand.vmem [shape: f32[2,1,96], index: 5, kind: input, shape index: {}]   ;;  %s3225_s6 = inlined_call_operand.vmem [shape: bf16[2,32,32], index: 6, kind: input, shape index: {}]   ;;  %s3226_s7 = inlined_call_operand.vmem [shape: f32[2,1,32], index: 7, kind: input, shape index: {}]   ;;  %s3227_s8 = inlined_call_operand.vmem [shape: f32[2,1,32], index: 8, kind: input, shape index: {}]   ;;  %s3228_s9 = inlined_call_operand.vmem [shape: f32[2,1,32], index: 9, kind: input, shape index: {}]   ;;  %s3229_s10 = inlined_call_operand.vmem [shape: bf16[2,32,64], index: 10, kind: input, shape index: {}]   ;;  %s3230_s11 = inlined_call_operand.vmem [shape: f32[2,1,64], index: 11, kind: input, shape index: {}]   ;;  %s3231_s12 = inlined_call_operand.vmem [shape: bf16[2,64,32], index: 12, kind: input, shape index: {}]   ;;  %s3232_s13 = inlined_call_operand.vmem [shape: f32[2,1,32], index: 13, kind: input, shape index: {}]   ;;  %s3233_s14 = inlined_call_operand.vmem [shape: f32[2,1,32], index: 14, kind: input, shape index: {}]   ;;  %s3234_s15 = inlined_call_operand.vmem [shape: f32[2,1,32], index: 15, kind: input, shape index: {}]   ;;  %s3235_s16 = inlined_call_operand.hbm [shape: f32[2,32], index: 16, kind: output, shape index: {0}]   ;;  %s3236_s17 = inlined_call_operand.hbm [shape: f32[2,8,8], index: 17, kind: output, shape index: {1}]  }
   0x1   :  { %3243 = sst [smem:[#allocation10_spill]] %s3219_s0 }
   0x2   :  { %3244 = sst [smem:[#allocation11_spill]] %s3220_s1 }
   0x3   :  { %3245 = sst [smem:[#allocation12_spill]] %s3221_s2 }
   0x4   :  { %3246 = sst [smem:[#allocation13_spill]] %s3222_s3 }
   0x5   :  { %3247 = sst [smem:[#allocation14_spill]] %s3223_s4 }
   0x6   :  { %3248 = sst [smem:[#allocation15_spill]] %s3225_s6 }
   0x7   :  { %3249 = sst [smem:[#allocation16_spill]] %s3235_s16 }
   0x8   :  { %3250 = sst [smem:[#allocation17_spill]] %s3236_s17 }
   0x9   :  { %23 = vsyncpa [#allocation4], 0 }
   0xa   :  { %24 = vsyncpa [#allocation6], 0  ;;  %s2799_s24 = smov 0  }
   0xb LB: > { %3251 = sst [smem:[#allocation9_spill]] %s2687_s24  ;;  %s2805_s25 = sadd.s32 4294967295, %s2687_s24   ;;  %s2687_s24 = sphi %s2799_s24, %s30_s24  }
   0xc   : > { %p2269_p0 = scmp.ge.s32.totalorder %s2687_s24, 1  ;;  %p576_p1 = scmp.lt.s32.totalorder %s2687_s24, 3 }
   0xe   : > { %p577_p2 = pnand %p2269_p0, %p576_p1 }
   0xf   : > { %p662_p3 = scmp.lt.s32.totalorder (!%p577_p2), %s2805_s25, 1  ;;  %s3252_s4 = sld [smem:[#allocation14_spill]] (!%p577_p2) }
  0x10   : > { %580 = sbr.rel (%p577_p2) target bundleno = 4239 (0x108f), region = 84  ;;  %s3253_s6 = sld [smem:[#allocation15_spill]] (!%p577_p2) }
  0x11   : > { %p2278_p4 = scmp.ne.s32.totalorder (!%p577_p2), %s2805_s25, 0 }
  0x17   : > { %s2811_s26 = scalar_select %p662_p3, %s2805_s25, 1 }
  0x18   : > { %710 = sbr.rel (%p2278_p4) target bundleno = 39 (0x27), region = 88  ;;  %s3254_s22 = sld [smem:[#allocation10_spill]] (!%p2278_p4)  ;;  %vm716_vm0 = vcmask (!%p2278_p4), 261120  }
  0x19   : > { %s2329_s27 = sshll.u32 %s2811_s26, 4  ;;  %s699_s3 = scalar_lea.vmem %s3232_s13, %s2811_s26 }
  0x1a   : > { %s666_s19 = scalar_lea.vmem %s3252_s4, %s2329_s27  ;;  %s2824_s21 = scalar_lea.vmem %s3253_s6, %s2329_s27 }
  0x1b   : > { %s2841_s18 = scalar_lea.vmem %s3229_s10, %s2329_s27  ;;  %s2332_s6 = sshll.u32 %s2811_s26, 5 }
  0x1c   : > { %s2851_s24 = scalar_lea.vmem %s3231_s12, %s2332_s6  ;;  %s702_s0 = scalar_lea.vmem %s3233_s14, %s2811_s26 }
  0x1d   : > { %s705_s2 = scalar_lea.vmem %s3234_s15, %s2811_s26  ;;  %s3255_s4 = sld [smem:[#allocation13_spill]] (!%p2278_p4) }
  0x1e   : > { %v711_v0 = vld [vmem:[%s3254_s22] sm:$0xff] (!%p2278_p4)  ;;  %v712_v2 = vld [vmem:[%s3254_s22 + $0x8] sm:$0xff] (!%p2278_p4) }
  0x23   : > { %v713_v1 = vld [vmem:[%s3255_s4] sm:$0xff] }
  0x24   : > { %v714_v3 = vadd.f32 %v713_v1, %v711_v0  ;;  %v715_v4 = vadd.f32 %v713_v1, %v712_v2 }
  0x26   : > { %717 = vst.msk [vmem:[#allocation2] sm:$0xff] %vm716_vm0, %v714_v3  ;;  %718 = vst.msk [vmem:[#allocation2 + $0x8] sm:$0xff] %vm716_vm0, %v715_v4 }
  0x27 PF: > { %v2555_v5 = vld [vmem:[%s666_s19] sm:$0xff]   ;;  %v2689_v6 = vmov 0.0   ;;  %v2556_v7 = vld [vmem:[%s666_s19 + $0x8] sm:$0xff]   ;;  %vm2690_vm1 = vmmov 0   ;;  %vm747_vm2 = vcmask 261120   ;;  %s3256_s29 = scalar_lea.vmem %s3224_s5, %s2811_s26  ;;  %s2691_s28 = smov 96  }
  0x28   : > { %2383 = vmatprep.subr.bf16.mxu0 %v2689_v6  ;;  %2391 = vmatprep.subr.bf16.mxu1 %v2689_v6  ;;  %v2279_v11 = vld [vmem:[%s3256_s29] ss:$0 sm:$0xff]  ;;  %vm807_vm3 = vcmask 64512   ;;  %s3257_s1 = sld [smem:[#allocation11_spill]]  ;;  %s2692_s23 = smov 64   ;;  %vm934_vm4 = vcmask 1043456  }
  0x29   : > { %2384 = vmatpush3.bf16.msra.mxu0 %v2555_v5  ;;  %2387 = vmatprep.mubr.msk.bf16.mxu0 %vm2690_vm1, %v2689_v6  ;;  %s2693_s16 = smov 88   ;;  %s2694_s17 = smov 120  }
  0x2a   : > { %2385 = vmatprep.subr.bf16.mxu0 %v2689_v6  ;;  %2393 = vmatprep.mubr.msk.bf16.mxu1 %vm2690_vm1, %v2689_v6  ;;  %s2695_s4 = smov 56   ;;  %s2696_s19 = smov 80  }
  0x2b   : > { %s2697_s29 = smov 112   ;;  %s2699_s27 = smov 72  }
  0x2c   : > { %s2700_s30 = smov 104   ;;  %s2701_s20 = smov 40  }
  0x2d   : > { %v2879_v8 = vld [vmem:[#allocation2] sm:$0xff]  ;;  %v2881_v9 = vld [vmem:[#allocation2 + $0x8] sm:$0xff]  ;;  %2386 = vmatpush3.bf16.msra.mxu0 %v2556_v7  ;;  %p2303_p5 = scmp.ne.s32.totalorder %s2805_s25, 1 }
  0x2e   : > { %v723_v10 = vpack.c.bf16 %v2881_v9, %v2879_v8  ;;  %2397 = vmatprep.subr.bf16.mxu0 %v2689_v6  ;;  %v2922_v28 = vld [vmem:[%s3257_s1] sm:$0xff]  ;;  %v2928_v33 = vld [vmem:[%s3257_s1 + $0x8] sm:$0xff] }
  0x30   : > { %2388 = vmatmul.mubr.msk.bf16.vlgmr.msra.gmra.mrb[0].mxu0 %vm747_vm2, %v723_v10 }
  0x31   : > { %2399 = vmatprep.mubr.msk.bf16.mxu0 %vm2690_vm1, %v2689_v6 }
 0x103   : > { %v785_v12 = vpop.f32.mrb[0].mxu0 }
 0x104   : > { %v786_v13 = vadd.f32 %v2279_v11, %v785_v12  ;;  %v2389_v14 = vpop.f32.mrb[1].mxu0 }
 0x105   : > { %v788_v15 = vpop.f32.mrb[2].mxu0 }
 0x106   : > { %v2897_v16 = vpack.c.bf16 %v786_v13, %v786_v13  ;;  %v789_v17 = vadd.f32 %v2279_v11, %v788_v15  ;;  %v2390_v18 = vpop.f32.mrb[3].mxu0  ;;  %v792_v22 = vmul.f32 0.35355338, %v786_v13 }
 0x108   : > { %805 = vrot.lane.b32.xlu0 %v2897_v16, %s2691_s28  ;;  %v2900_v19 = vpack.c.bf16 %v789_v17, %v789_v17  ;;  %v2906_v25 = vpack.c.bf16 %v792_v22, %v792_v22  ;;  %v793_v26 = vmul.f32 0.35355338, %v789_v17 }
 0x10a   : > { %v2913_v27 = vpack.c.bf16 %v793_v26, %v793_v26 }
 0x10c   : > { %855 = vrot.lane.b32.xlu0 %v2900_v19, %s2691_s28  ;;  %s2698_s28 = smov 48  }
 0x17a   : > { %v806_v20 = vpop.permute.xlu0 %805 }
 0x17b   : > { %v812_v21 = vsel %vm807_vm3, %v806_v20, 0 }
 0x17c   : > { %2392 = vmatpush3.bf16.xpose.msra.mxu1 %v812_v21 }
 0x17d   : > { %2403 = vmatprep.subr.bf16.mxu1 %v2689_v6 }
 0x17e   : > { %v856_v23 = vpop.permute.xlu0 %855 }
 0x17f   : > { %v861_v24 = vsel %vm807_vm3, %v856_v23, 0 }
 0x180   : > { %2398 = vmatpush3.bf16.xpose.msra.mxu0 %v861_v24 }
 0x181   : > { %2409 = vmatprep.subr.bf16.mxu0 %v2689_v6 }
 0x183   : > { %2394 = vmatmul.mubr.msk.bf16.vlgmr.msra.gmra.mrb[0].mxu1 %vm807_vm3, %v2906_v25 }
 0x184   : > { %2405 = vmatprep.mubr.msk.bf16.mxu1 %vm2690_vm1, %v2689_v6 }
 0x187   : > { %2400 = vmatmul.mubr.msk.bf16.vlgmr.msra.gmra.mrb[4].mxu0 %vm807_vm3, %v2913_v27 }
 0x188   : > { %2411 = vmatprep.mubr.msk.bf16.mxu0 %vm2690_vm1, %v2689_v6 }
 0x256   : > { %v848_v29 = vpop.f32.mrb[0].mxu1 }
 0x257   : > { %v849_v30 = vadd.f32 %v848_v29, %v2922_v28  ;;  %v2395_v31 = vpop.f32.mrb[1].mxu1 }
 0x258   : > { %v851_v32 = vpop.f32.mrb[2].mxu1 }
 0x259   : > { %v2396_v34 = vpop.f32.mrb[3].mxu1  ;;  %v903_v35 = vsel %vm807_vm3, %v849_v30, -inf }
 0x25a   : > { %904 = vmax.xlane.f32.xlu1 %v903_v35  ;;  %v897_v36 = vpop.f32.mrb[4].mxu0 }
 0x25b   : > { %v898_v37 = vadd.f32 %v897_v36, %v2928_v33  ;;  %v2401_v38 = vpop.f32.mrb[5].mxu0 }
 0x25c   : > { %v900_v39 = vpop.f32.mrb[6].mxu0 }
 0x25d   : > { %v2402_v40 = vpop.f32.mrb[7].mxu0  ;;  %v906_v41 = vsel %vm807_vm3, %v898_v37, -inf }
 0x25e   : > { %907 = vmax.xlane.f32.xlu1 %v906_v41 }
 0x26f   : > { %929 = vrot.lane.b32.xlu1 %v2897_v16, %s2692_s23 }
 0x273   : > { %978 = vrot.lane.b32.xlu1 %v2900_v19, %s2692_s23 }
 0x277   : > { %1028 = vrot.lane.b32.xlu1 %v2897_v16, %s2693_s16 }
 0x2e7   : > { %v905_v42 = vpop.xlane.xlu1 %904 }
 0x2e8   : > { %v909_v43 = vsub.f32 %v849_v30, %v905_v42 }
 0x2ea   : > { %v911_v44 = vmul.f32 1.442695, %v909_v43 }
 0x2eb   : > { %v908_v45 = vpop.xlane.xlu1 %907 }
 0x2ec   : > { %2557 = vpow2.f32 %v911_v44  ;;  %v910_v46 = vsub.f32 %v898_v37, %v908_v45 }
 0x2ee   : > { %v913_v47 = vmul.f32 1.442695, %v910_v46 }
 0x2ef   : > { %v930_v48 = vpop.permute.xlu1 %929 }
 0x2f0   : > { %2559 = vpow2.f32 %v913_v47  ;;  %v936_v49 = vsel %vm934_vm4, %v930_v48, 0 }
 0x2f1   : > { %2404 = vmatpush3.bf16.msra.mxu1 %v936_v49 }
 0x2f2   : > { %2415 = vmatprep.subr.bf16.mxu1 %v2689_v6 }
 0x2f3   : > { %v979_v50 = vpop.permute.xlu1 %978 }
 0x2f4   : > { %v984_v51 = vsel %vm934_vm4, %v979_v50, 0 }
 0x2f5   : > { %2410 = vmatpush3.bf16.msra.mxu0 %v984_v51 }
 0x2f6   : > { %v2558_v52 = vpop.eup %2557  ;;  %2421 = vmatprep.subr.bf16.mxu0 %v2689_v6 }
 0x2f7   : > { %v915_v53 = vsel %vm807_vm3, %v2558_v52, 0.0  ;;  %v1029_v56 = vpop.permute.xlu1 %1028 }
 0x2f8   : > { %916 = vadd.xlane.f32.xlu0 %v915_v53  ;;  %v1034_v63 = vsel %vm807_vm3, %v1029_v56, 0 }
 0x2fa   : > { %v2560_v54 = vpop.eup %2559 }
 0x2fb   : > { %v918_v55 = vsel %vm807_vm3, %v2560_v54, 0.0 }
 0x2fc   : > { %919 = vadd.xlane.f32.xlu1 %v918_v55 }
 0x30d   : > { %1078 = vrot.lane.b32.xlu1 %v2900_v19, %s2693_s16 }
 0x30e   : > { %1026 = vrot.lane.b32.xlu0 %v2906_v25, %s2694_s17 }
 0x311   : > { %1076 = vrot.lane.b32.xlu1 %v2913_v27, %s2694_s17 }
 0x385   : > { %v917_v57 = vpop.xlane.xlu0 %916 }
 0x386   : > { %2561 = vrcp.f32 %v917_v57 }
 0x389   : > { %v920_v58 = vpop.xlane.xlu1 %919  ;;  %v1027_v4 = vpop.permute.xlu0 %1026 }
 0x38a   : > { %2563 = vrcp.f32 %v920_v58 }
 0x38d   : > { %v1079_v1 = vpop.permute.xlu1 %1078 }
 0x38e   : > { %v1084_v3 = vsel %vm807_vm3, %v1079_v1, 0 }
 0x390   : > { %v2562_v59 = vpop.eup %2561 }
 0x391   : > { %v2945_v60 = vmul.f32 %v2562_v59, %v2558_v52  ;;  %v1077_v5 = vpop.permute.xlu1 %1076 }
 0x393   : > { %v927_v61 = vpack.c.bf16 %v2945_v60, %v2945_v60 }
 0x394   : > { %v2564_v62 = vpop.eup %2563 }
 0x395   : > { %v2950_v0 = vmul.f32 %v2564_v62, %v2560_v54  ;;  %2406 = vmatmul.mubr.msk.bf16.vlgmr.msra.gmra.mrb[4].mxu1 %vm807_vm3, %v927_v61 }
 0x396   : > { %2416 = vmatpush3.bf16.xpose.msra.mxu1 %v1034_v63  ;;  %2417 = vmatprep.mubr.msk.bf16.mxu1 %vm2690_vm1, %v2689_v6 }
 0x397   : > { %v928_v2 = vpack.c.bf16 %v2950_v0, %v2950_v0  ;;  %2427 = vmatprep.subr.bf16.mxu1 %v2689_v6 }
 0x399   : > { %2412 = vmatmul.mubr.msk.bf16.vlgmr.msra.gmra.mrb[8].mxu0 %vm807_vm3, %v928_v2 }
 0x39a   : > { %2422 = vmatpush3.bf16.xpose.msra.mxu0 %v1084_v3  ;;  %2423 = vmatprep.mubr.msk.bf16.mxu0 %vm2690_vm1, %v2689_v6 }
 0x39b   : > { %2433 = vmatprep.subr.bf16.mxu0 %v2689_v6 }
 0x39d   : > { %2418 = vmatmul.mubr.msk.bf16.vlgmr.msra.gmra.mrb[8].mxu1 %vm807_vm3, %v1027_v4 }
 0x39e   : > { %2429 = vmatprep.mubr.msk.bf16.mxu1 %vm2690_vm1, %v2689_v6 }
 0x3a1   : > { %2424 = vmatmul.mubr.msk.bf16.vlgmr.msra.gmra.mrb[12].mxu0 %vm807_vm3, %v1077_v5 }
 0x3a2   : > { %2435 = vmatprep.mubr.msk.bf16.mxu0 %vm2690_vm1, %v2689_v6 }
 0x468   : > { %v2969_v7 = vpop.f32.mrb[4].mxu1 }
 0x469   : > { %v2407_v10 = vpop.f32.mrb[5].mxu1 }
 0x46a   : > { %v975_v11 = vpop.f32.mrb[6].mxu1 }
 0x46b   : > { %v2408_v12 = vpop.f32.mrb[7].mxu1 }
 0x46c   : > { %v2971_v13 = vpop.f32.mrb[8].mxu0 }
 0x46d   : > { %v2413_v14 = vpop.f32.mrb[9].mxu0 }
 0x46e   : > { %v1023_v15 = vpop.f32.mrb[10].mxu0 }
 0x46f   : > { %v2414_v17 = vpop.f32.mrb[11].mxu0 }
 0x470   : > { %v1070_v18 = vpop.f32.mrb[8].mxu1 }
 0x471   : > { %v1071_v20 = vadd.f32 %v1070_v18, %v2922_v28  ;;  %v2419_v21 = vpop.f32.mrb[9].mxu1 }
 0x472   : > { %v1073_v22 = vpop.f32.mrb[10].mxu1 }
 0x473   : > { %v2420_v23 = vpop.f32.mrb[11].mxu1  ;;  %v1126_v24 = vsel %vm807_vm3, %v1071_v20, -inf }
 0x474   : > { %1127 = vmax.xlane.f32.xlu1 %v1126_v24  ;;  %v1120_v26 = vpop.f32.mrb[12].mxu0 }
 0x475   : > { %v1121_v29 = vadd.f32 %v1120_v26, %v2928_v33  ;;  %v2425_v30 = vpop.f32.mrb[13].mxu0 }
 0x476   : > { %v1123_v31 = vpop.f32.mrb[14].mxu0 }
 0x477   : > { %v2426_v32 = vpop.f32.mrb[15].mxu0  ;;  %v1129_v34 = vsel %vm807_vm3, %v1121_v29, -inf }
 0x478   : > { %1130 = vmax.xlane.f32.xlu0 %v1129_v34 }
 0x485   : > { %1152 = vrot.lane.b32.xlu1 %v2897_v16, %s2695_s4 }
 0x489   : > { %1250 = vrot.lane.b32.xlu1 %v2897_v16, %s2696_s19 }
 0x48e   : > { %1200 = vrot.lane.b32.xlu0 %v2900_v19, %s2695_s4 }
 0x492   : > { %1248 = vrot.lane.b32.xlu0 %v2906_v25, %s2697_s29 }
 0x501   : > { %v1128_v35 = vpop.xlane.xlu1 %1127 }
 0x502   : > { %v1132_v36 = vsub.f32 %v1071_v20, %v1128_v35 }
 0x504   : > { %v1134_v37 = vmul.f32 1.442695, %v1132_v36 }
 0x505   : > { %v1153_v38 = vpop.permute.xlu1 %1152  ;;  %v1131_v39 = vpop.xlane.xlu0 %1130 }
 0x506   : > { %2565 = vpow2.f32 %v1134_v37  ;;  %v1158_v40 = vsel %vm934_vm4, %v1153_v38, 0  ;;  %v1133_v41 = vsub.f32 %v1121_v29, %v1131_v39 }
 0x507   : > { %2428 = vmatpush3.bf16.msra.mxu1 %v1158_v40 }
 0x508   : > { %v1136_v42 = vmul.f32 1.442695, %v1133_v41  ;;  %2439 = vmatprep.subr.bf16.mxu1 %v2689_v6 }
 0x509   : > { %v1201_v43 = vpop.permute.xlu0 %1200  ;;  %v1251_v49 = vpop.permute.xlu1 %1250 }
 0x50a   : > { %2567 = vpow2.f32 %v1136_v42  ;;  %v1206_v44 = vsel %vm934_vm4, %v1201_v43, 0  ;;  %v1256_v56 = vsel %vm807_vm3, %v1251_v49, 0 }
 0x50b   : > { %2434 = vmatpush3.bf16.msra.mxu0 %v1206_v44 }
 0x50c   : > { %2445 = vmatprep.subr.bf16.mxu0 %v2689_v6 }
 0x50d   : > { %v1249_v62 = vpop.permute.xlu0 %1248 }
 0x510   : > { %v2566_v45 = vpop.eup %2565 }
 0x511   : > { %v1138_v46 = vsel %vm807_vm3, %v2566_v45, 0.0 }
 0x512   : > { %1139 = vadd.xlane.f32.xlu1 %v1138_v46 }
 0x514   : > { %v2568_v47 = vpop.eup %2567 }
 0x515   : > { %v1141_v48 = vsel %vm807_vm3, %v2568_v47, 0.0 }
 0x516   : > { %1142 = vadd.xlane.f32.xlu1 %v1141_v48 }
 0x527   : > { %1300 = vrot.lane.b32.xlu1 %v2900_v19, %s2696_s19 }
 0x52b   : > { %1298 = vrot.lane.b32.xlu1 %v2913_v27, %s2697_s29 }
 0x59f   : > { %v1140_v50 = vpop.xlane.xlu1 %1139 }
 0x5a0   : > { %2569 = vrcp.f32 %v1140_v50 }
 0x5a3   : > { %v1143_v51 = vpop.xlane.xlu1 %1142 }
 0x5a4   : > { %2571 = vrcp.f32 %v1143_v51 }
 0x5a7   : > { %v1301_v58 = vpop.permute.xlu1 %1300 }
 0x5a8   : > { %v1306_v61 = vsel %vm807_vm3, %v1301_v58, 0 }
 0x5aa   : > { %v2570_v52 = vpop.eup %2569 }
 0x5ab   : > { %v2989_v53 = vmul.f32 %v2570_v52, %v2566_v45  ;;  %v1299_v63 = vpop.permute.xlu1 %1298 }
 0x5ad   : > { %v1150_v54 = vpack.c.bf16 %v2989_v53, %v2989_v53  ;;  %v1148_v49 = vadd.f32 %v2989_v53, %v2945_v60 }
 0x5ae   : > { %v2572_v55 = vpop.eup %2571 }
 0x5af   : > { %v2994_v57 = vmul.f32 %v2572_v55, %v2568_v47  ;;  %2430 = vmatmul.mubr.msk.bf16.vlgmr.msra.gmra.mrb[12].mxu1 %vm807_vm3, %v1150_v54 }
 0x5b0   : > { %2440 = vmatpush3.bf16.xpose.msra.mxu1 %v1256_v56  ;;  %2441 = vmatprep.mubr.msk.bf16.mxu1 %vm2690_vm1, %v2689_v6 }
 0x5b1   : > { %v1151_v59 = vpack.c.bf16 %v2994_v57, %v2994_v57  ;;  %2451 = vmatprep.subr.bf16.mxu1 %v2689_v6  ;;  %v1149_v54 = vadd.f32 %v2994_v57, %v2950_v0 }
 0x5b3   : > { %2436 = vmatmul.mubr.msk.bf16.vlgmr.msra.gmra.mrb[16].mxu0 %vm807_vm3, %v1151_v59 }
 0x5b4   : > { %2446 = vmatpush3.bf16.xpose.msra.mxu0 %v1306_v61  ;;  %2447 = vmatprep.mubr.msk.bf16.mxu0 %vm2690_vm1, %v2689_v6 }
 0x5b5   : > { %2457 = vmatprep.subr.bf16.mxu0 %v2689_v6 }
 0x5b7   : > { %2442 = vmatmul.mubr.msk.bf16.vlgmr.msra.gmra.mrb[16].mxu1 %vm807_vm3, %v1249_v62 }
 0x5b8   : > { %2453 = vmatprep.mubr.msk.bf16.mxu1 %vm2690_vm1, %v2689_v6 }
 0x5bb   : > { %2448 = vmatmul.mubr.msk.bf16.vlgmr.msra.gmra.mrb[20].mxu0 %vm807_vm3, %v1299_v63 }
 0x5bc   : > { %2459 = vmatprep.mubr.msk.bf16.mxu0 %vm2690_vm1, %v2689_v6 }
 0x682   : > { %v3013_v1 = vpop.f32.mrb[12].mxu1 }
 0x683   : > { %v2431_v2 = vpop.f32.mrb[13].mxu1 }
 0x684   : > { %v1197_v3 = vpop.f32.mrb[14].mxu1 }
 0x685   : > { %v2432_v4 = vpop.f32.mrb[15].mxu1 }
 0x686   : > { %v3015_v5 = vpop.f32.mrb[16].mxu0 }
 0x687   : > { %v2437_v10 = vpop.f32.mrb[17].mxu0 }
 0x688   : > { %v1245_v11 = vpop.f32.mrb[18].mxu0 }
 0x689   : > { %v2438_v12 = vpop.f32.mrb[19].mxu0 }
 0x68a   : > { %v1292_v14 = vpop.f32.mrb[16].mxu1 }
 0x68b   : > { %v1293_v15 = vadd.f32 %v1292_v14, %v2922_v28  ;;  %v2443_v17 = vpop.f32.mrb[17].mxu1 }
 0x68c   : > { %v1295_v18 = vpop.f32.mrb[18].mxu1 }
 0x68d   : > { %v2444_v20 = vpop.f32.mrb[19].mxu1  ;;  %v1348_v21 = vsel %vm807_vm3, %v1293_v15, -inf }
 0x68e   : > { %1349 = vmax.xlane.f32.xlu0 %v1348_v21  ;;  %v1342_v22 = vpop.f32.mrb[20].mxu0 }
 0x68f   : > { %v1343_v23 = vadd.f32 %v1342_v22, %v2928_v33  ;;  %v2449_v24 = vpop.f32.mrb[21].mxu0 }
 0x690   : > { %v1345_v26 = vpop.f32.mrb[22].mxu0 }
 0x691   : > { %v2450_v29 = vpop.f32.mrb[23].mxu0  ;;  %v1351_v30 = vsel %vm807_vm3, %v1343_v23, -inf }
 0x692   : > { %1352 = vmax.xlane.f32.xlu1 %v1351_v30 }
 0x6a3   : > { %1374 = vrot.lane.b32.xlu1 %v2897_v16, %s2698_s28 }
 0x6a7   : > { %1472 = vrot.lane.b32.xlu1 %v2897_v16, %s2699_s27 }
 0x6ab   : > { %1522 = vrot.lane.b32.xlu1 %v2900_v19, %s2699_s27 }
 0x6af   : > { %1520 = vrot.lane.b32.xlu1 %v2913_v27, %s2700_s30 }
 0x71b   : > { %v1350_v31 = vpop.xlane.xlu0 %1349 }
 0x71c   : > { %v1354_v32 = vsub.f32 %v1293_v15, %v1350_v31 }
 0x71e   : > { %v1356_v34 = vmul.f32 1.442695, %v1354_v32 }
 0x71f   : > { %v1353_v35 = vpop.xlane.xlu1 %1352 }
 0x720   : > { %2573 = vpow2.f32 %v1356_v34  ;;  %v1355_v36 = vsub.f32 %v1343_v23, %v1353_v35 }
 0x722   : > { %v1358_v37 = vmul.f32 1.442695, %v1355_v36 }
 0x723   : > { %v1375_v38 = vpop.permute.xlu1 %1374 }
 0x724   : > { %2575 = vpow2.f32 %v1358_v37  ;;  %v1380_v39 = vsel %vm934_vm4, %v1375_v38, 0 }
 0x725   : > { %2452 = vmatpush3.bf16.msra.mxu1 %v1380_v39 }
 0x726   : > { %2463 = vmatprep.subr.bf16.mxu1 %v2689_v6 }
 0x727   : > { %v1473_v48 = vpop.permute.xlu1 %1472 }
 0x728   : > { %v1478_v55 = vsel %vm807_vm3, %v1473_v48, 0 }
 0x72a   : > { %v2574_v40 = vpop.eup %2573 }
 0x72b   : > { %v1360_v41 = vsel %vm807_vm3, %v2574_v40, 0.0  ;;  %v1523_v58 = vpop.permute.xlu1 %1522 }
 0x72c   : > { %1361 = vadd.xlane.f32.xlu0 %v1360_v41  ;;  %v1528_v53 = vsel %vm807_vm3, %v1523_v58, 0 }
 0x72e   : > { %v2576_v42 = vpop.eup %2575 }
 0x72f   : > { %v1363_v27 = vsel %vm807_vm3, %v2576_v42, 0.0  ;;  %v1521_v57 = vpop.permute.xlu1 %1520 }
 0x730   : > { %1364 = vadd.xlane.f32.xlu0 %v1363_v27 }
 0x746   : > { %1422 = vrot.lane.b32.xlu0 %v2900_v19, %s2698_s28 }
 0x74a   : > { %1470 = vrot.lane.b32.xlu0 %v2906_v25, %s2700_s30 }
 0x7b9   : > { %v1362_v43 = vpop.xlane.xlu0 %1361 }
 0x7ba   : > { %2577 = vrcp.f32 %v1362_v43 }
 0x7bd   : > { %v1365_v44 = vpop.xlane.xlu0 %1364 }
 0x7be   : > { %2579 = vrcp.f32 %v1365_v44 }
 0x7c1   : > { %v1423_v45 = vpop.permute.xlu0 %1422 }
 0x7c2   : > { %v1428_v46 = vsel %vm934_vm4, %v1423_v45, 0 }
 0x7c3   : > { %2458 = vmatpush3.bf16.msra.mxu0 %v1428_v46 }
 0x7c4   : > { %v2578_v47 = vpop.eup %2577  ;;  %2469 = vmatprep.subr.bf16.mxu0 %v2689_v6 }
 0x7c5   : > { %v1368_v50 = vmul.f32 %v2578_v47, %v2574_v40  ;;  %v1471_v0 = vpop.permute.xlu0 %1470 }
 0x7c7   : > { %v3035_v51 = vadd.f32 %v1368_v50, %v1148_v49  ;;  %v1372_v52 = vpack.c.bf16 %v1368_v50, %v1368_v50 }
 0x7c8   : > { %v2580_v25 = vpop.eup %2579 }
 0x7c9   : > { %v1369_v56 = vmul.f32 %v2580_v25, %v2576_v42  ;;  %2454 = vmatmul.mubr.msk.bf16.vlgmr.msra.gmra.mrb[20].mxu1 %vm807_vm3, %v1372_v52 }
 0x7ca   : > { %2464 = vmatpush3.bf16.xpose.msra.mxu1 %v1478_v55  ;;  %2465 = vmatprep.mubr.msk.bf16.mxu1 %vm2690_vm1, %v2689_v6 }
 0x7cb   : > { %v3043_v59 = vadd.f32 %v1369_v56, %v1149_v54  ;;  %v1373_v60 = vpack.c.bf16 %v1369_v56, %v1369_v56  ;;  %2475 = vmatprep.subr.bf16.mxu1 %v2689_v6 }
 0x7cd   : > { %2460 = vmatmul.mubr.msk.bf16.vlgmr.msra.gmra.mrb[24].mxu0 %vm807_vm3, %v1373_v60 }
 0x7ce   : > { %2470 = vmatpush3.bf16.xpose.msra.mxu0 %v1528_v53  ;;  %2471 = vmatprep.mubr.msk.bf16.mxu0 %vm2690_vm1, %v2689_v6 }
 0x7cf   : > { %2481 = vmatprep.subr.bf16.mxu0 %v2689_v6 }
 0x7d1   : > { %2466 = vmatmul.mubr.msk.bf16.vlgmr.msra.gmra.mrb[24].mxu1 %vm807_vm3, %v1471_v0 }
 0x7d2   : > { %2477 = vmatprep.mubr.msk.bf16.mxu1 %vm2690_vm1, %v2689_v6 }
 0x7d5   : > { %2472 = vmatmul.mubr.msk.bf16.vlgmr.msra.gmra.mrb[28].mxu0 %vm807_vm3, %v1521_v57 }
 0x7d6   : > { %2483 = vmatprep.mubr.msk.bf16.mxu0 %vm2690_vm1, %v2689_v6 }
 0x89c   : > { %v3057_v61 = vpop.f32.mrb[20].mxu1 }
 0x89d   : > { %v2455_v62 = vpop.f32.mrb[21].mxu1 }
 0x89e   : > { %v1419_v63 = vpop.f32.mrb[22].mxu1 }
 0x89f   : > { %v2456_v2 = vpop.f32.mrb[23].mxu1 }
 0x8a0   : > { %v3059_v3 = vpop.f32.mrb[24].mxu0 }
 0x8a1   : > { %v2461_v4 = vpop.f32.mrb[25].mxu0 }
 0x8a2   : > { %v1467_v10 = vpop.f32.mrb[26].mxu0 }
 0x8a3   : > { %v2462_v11 = vpop.f32.mrb[27].mxu0 }
 0x8a4   : > { %v1514_v12 = vpop.f32.mrb[24].mxu1 }
 0x8a5   : > { %v1515_v14 = vadd.f32 %v1514_v12, %v2922_v28  ;;  %v2467_v15 = vpop.f32.mrb[25].mxu1 }
 0x8a6   : > { %v1517_v17 = vpop.f32.mrb[26].mxu1 }
 0x8a7   : > { %v2468_v18 = vpop.f32.mrb[27].mxu1  ;;  %v1570_v20 = vsel %vm807_vm3, %v1515_v14, -inf }
 0x8a8   : > { %1571 = vmax.xlane.f32.xlu0 %v1570_v20  ;;  %v1564_v21 = vpop.f32.mrb[28].mxu0 }
 0x8a9   : > { %v1565_v22 = vadd.f32 %v1564_v21, %v2928_v33  ;;  %v2473_v23 = vpop.f32.mrb[29].mxu0 }
 0x8aa   : > { %v1567_v24 = vpop.f32.mrb[30].mxu0 }
 0x8ab   : > { %v2474_v26 = vpop.f32.mrb[31].mxu0  ;;  %v1573_v29 = vsel %vm807_vm3, %v1565_v22, -inf }
 0x8ac   : > { %1574 = vmax.xlane.f32.xlu1 %v1573_v29 }
 0x8bd   : > { %1596 = vrot.lane.b32.xlu1 %v2897_v16, %s2701_s20 }
 0x935   : > { %v1572_v30 = vpop.xlane.xlu0 %1571 }
 0x936   : > { %v1576_v28 = vsub.f32 %v1515_v14, %v1572_v30 }
 0x938   : > { %v1578_v31 = vmul.f32 1.442695, %v1576_v28 }
 0x939   : > { %v1575_v32 = vpop.xlane.xlu1 %1574 }
 0x93a   : > { %2581 = vpow2.f32 %v1578_v31  ;;  %v1577_v34 = vsub.f32 %v1565_v22, %v1575_v32 }
 0x93c   : > { %v1580_v35 = vmul.f32 1.442695, %v1577_v34 }
 0x93d   : > { %v1597_v36 = vpop.permute.xlu1 %1596 }
 0x93e   : > { %2583 = vpow2.f32 %v1580_v35  ;;  %v1602_v33 = vsel %vm934_vm4, %v1597_v36, 0 }
 0x93f   : > { %2476 = vmatpush3.bf16.msra.mxu1 %v1602_v33 }
 0x944   : > { %v2582_v37 = vpop.eup %2581 }
 0x945   : > { %v1582_v38 = vsel %vm807_vm3, %v2582_v37, 0.0 }
 0x946   : > { %1583 = vadd.xlane.f32.xlu0 %v1582_v38 }
 0x948   : > { %v2584_v39 = vpop.eup %2583 }
 0x949   : > { %v1585_v40 = vsel %vm807_vm3, %v2584_v39, 0.0 }
 0x94a   : > { %1586 = vadd.xlane.f32.xlu0 %v1585_v40 }
 0x960   : > { %1644 = vrot.lane.b32.xlu0 %v2900_v19, %s2701_s20 }
 0x9d3   : > { %v1584_v16 = vpop.xlane.xlu0 %1583 }
 0x9d4   : > { %2585 = vrcp.f32 %v1584_v16 }
 0x9d7   : > { %v1587_v41 = vpop.xlane.xlu0 %1586 }
 0x9d8   : > { %2587 = vrcp.f32 %v1587_v41 }
 0x9db   : > { %v1645_v42 = vpop.permute.xlu0 %1644 }
 0x9dc   : > { %v1650_v27 = vsel %vm934_vm4, %v1645_v42, 0 }
 0x9dd   : > { %2482 = vmatpush3.bf16.msra.mxu0 %v1650_v27 }
 0x9de   : > { %v2586_v43 = vpop.eup %2585 }
 0x9df   : > { %v1590_v44 = vmul.f32 %v2586_v43, %v2582_v37 }
 0x9e1   : > { %v1592_v45 = vadd.f32 %v1590_v44, %v3035_v51  ;;  %v1594_v46 = vpack.c.bf16 %v1590_v44, %v1590_v44 }
 0x9e2   : > { %v2588_v47 = vpop.eup %2587 }
 0x9e3   : > { %v1591_v48 = vmul.f32 %v2588_v47, %v2584_v39  ;;  %2478 = vmatmul.mubr.msk.bf16.vlgmr.msra.gmra.mrb[28].mxu1 %vm807_vm3, %v1594_v46  ;;  %v1696_v51 = vmul.f32 (!%p2303_p5), 0.25, %v1592_v45 }
 0x9e5   : > { %v1593_v49 = vadd.f32 %v1591_v48, %v3043_v59  ;;  %v1595_v19 = vpack.c.bf16 %v1591_v48, %v1591_v48  ;;  %1698 = vst.msk [vmem:[#allocation5] sm:$0xff] (!%p2303_p5), %vm807_vm3, %v1696_v51 }
 0x9e7   : > { %2484 = vmatmul.mubr.msk.bf16.vlgmr.msra.gmra.mrb[32].mxu0 %vm807_vm3, %v1595_v19  ;;  %v1697_v53 = vmul.f32 (!%p2303_p5), 0.25, %v1593_v49 }
 0x9e9   : > { %1699 = vst.msk [vmem:[#allocation5 + $0x8] sm:$0xff] (!%p2303_p5), %vm807_vm3, %v1697_v53 }
 0xab6   : > { %v1638_v50 = vpop.f32.mrb[28].mxu1 }
 0xab7   : > { %v2479_v52 = vpop.f32.mrb[29].mxu1  ;;  %1695 = sbr.rel (%p2303_p5) target bundleno = 2750 (0xabe), region = 92 }
 0xab8   : > { %v1641_v25 = vpop.f32.mrb[30].mxu1 }
 0xab9   : > { %v2480_v54 = vpop.f32.mrb[31].mxu1 }
 0xaba   : > { %v1686_v55 = vpop.f32.mrb[32].mxu0 }
 0xabb   : > { %v2485_v56 = vpop.f32.mrb[33].mxu0 }
 0xabc   : > { %v1689_v58 = vpop.f32.mrb[34].mxu0 }
 0xabd   : > { %v2486_v60 = vpop.f32.mrb[35].mxu0 }
 0xabe PF: > { %v2589_v59 = vpack.i.bf16 %v3015_v5, %v3013_v1  ;;  %v2599_v0 = vpack.i.bf16 %v1686_v55, %v1638_v50  ;;  %2487 = vmatprep.subr.bf16.mxu1 %v2689_v6  ;;  %2491 = vmatprep.mubr.msk.bf16.mxu1 %vm2690_vm1, %v2689_v6  ;;  %v2604_v57 = vld [vmem:[%s2824_s21] sm:$0xff]   ;;  %s2702_s6 = smov 8   ;;  %v2594_v62 = vpack.i.bf16 %v3059_v3, %v3057_v61  ;;  %s2703_s23 = smov 24   ;;  %v2605_v1 = vld [vmem:[%s2824_s21 + $0x8] sm:$0xff]   ;;  %vm1726_vm5 = vcmask 130048  }
 0xabf   : > { %2495 = vmatprep.subr.bf16.mxu0 %v2689_v6  ;;  %2499 = vmatprep.mubr.msk.bf16.mxu0 %vm2690_vm1, %v2689_v6  ;;  %s2704_s16 = smov 16   ;;  %vm1729_vm6 = vcmask 195584   ;;  %s3258_s4 = scalar_lea.vmem %s3226_s7, %s2811_s26  ;;  %v2606_v41 = vld [vmem:[%s2841_s18] sm:$0xff]   ;;  %v2607_v42 = vld [vmem:[%s2841_s18 + $0x8] sm:$0xff]   ;;  %vm1957_vm7 = vcmask 523264   ;;  %vm2083_vm8 = vcmask (!%p2303_p5), 1041409  }
 0xac0   : > { %2590 = vrot.lane.b32.xlu0 %v2589_v59, %s2702_s6  ;;  %2600 = vrot.lane.b32.xlu1 %v2599_v0, %s2703_s23  ;;  %v2304_v23 = vld [vmem:[%s3258_s4] ss:$0 sm:$0xff]  ;;  %v2609_v43 = vld [vmem:[%s2851_s24 + $0x8] sm:$0xff]   ;;  %s3259_s29 = scalar_lea.vmem %s3227_s8, %s2811_s26  ;;  %s3260_s30 = scalar_lea.vmem %s3228_s9, %s2811_s26  ;;  %vm2086_vm9 = vcmask (!%p2303_p5), 254976  }
 0xac1   : > { %2488 = vmatpush3.bf16.msra.mxu1 %v2604_v57  ;;  %2496 = vmatpush3.bf16.msra.mxu0 %v2606_v41  ;;  %v2608_v27 = vld [vmem:[%s2851_s24] sm:$0xff]   ;;  %v2610_v59 = vld [vmem:[%s2851_s24 + $0x10] sm:$0xff]   ;;  %v2611_v0 = vld [vmem:[%s2851_s24 + $0x18] sm:$0xff]  }
 0xac2   : > { %2489 = vmatprep.subr.bf16.mxu1 %v2689_v6  ;;  %2497 = vmatprep.subr.bf16.mxu0 %v2689_v6  ;;  %v2308_v50 = vld [vmem:[%s3259_s29] ss:$0 sm:$0xff]  ;;  %s3262_s29 = sld [smem:[#allocation12_spill]] (!%p2303_p5) }
 0xac3   : > { %v2309_v56 = vld [vmem:[%s3260_s30] ss:$0 sm:$0xff] }
 0xac4   : > { %2595 = vrot.lane.b32.xlu0 %v2594_v62, %s2704_s16  ;;  %s3261_s16 = scalar_lea.vmem %s3230_s11, %s2811_s26  ;;  %v2321_v41 = vld [vmem:[%s705_s2] ss:$0 sm:$0xff] }
 0xac5   : > { %2490 = vmatpush3.bf16.msra.mxu1 %v2605_v1  ;;  %2498 = vmatpush3.bf16.msra.mxu0 %v2607_v42  ;;  %v2310_v57 = vld [vmem:[%s3261_s16] ss:$0 sm:$0xff] }
 0xac6   : > { %2503 = vmatprep.subr.bf16.mxu1 %v2689_v6 }
 0xb32   : > { %v2591_v5 = vpop.permute.xlu0 %2590  ;;  %v2601_v63 = vpop.permute.xlu1 %2600 }
 0xb33   : > { %v2593_v2 = vunpack.i.h.bf16 %v2591_v5  ;;  %v2592_v4 = vunpack.i.l.bf16 %v2591_v5  ;;  %v2603_v11 = vunpack.i.h.bf16 %v2601_v63  ;;  %v2602_v61 = vunpack.i.l.bf16 %v2601_v63 }
 0xb35   : > { %v1725_v14 = vsel %vm807_vm3, %v2971_v13, %v2593_v2  ;;  %v1724_v15 = vsel %vm807_vm3, %v2969_v7, %v2592_v4 }
 0xb36   : > { %v2596_v10 = vpop.permute.xlu0 %2595 }
 0xb37   : > { %v2598_v3 = vunpack.i.h.bf16 %v2596_v10  ;;  %v2597_v12 = vunpack.i.l.bf16 %v2596_v10 }
 0xb39   : > { %v1727_v17 = vsel %vm1726_vm5, %v1724_v15, %v2597_v12  ;;  %v1728_v18 = vsel %vm1726_vm5, %v1725_v14, %v2598_v3 }
 0xb3a   : > { %v1730_v20 = vsel %vm1729_vm6, %v1727_v17, %v2602_v61  ;;  %v1731_v21 = vsel %vm1729_vm6, %v1728_v18, %v2603_v11 }
 0xb3b   : > { %v1732_v22 = vpack.c.bf16 %v1731_v21, %v1730_v20 }
 0xb3d   : > { %2492 = vmatmul.mubr.msk.bf16.vlgmr.msra.gmra.mrb[32].mxu1 %vm747_vm2, %v1732_v22 }
 0xb3e   : > { %2511 = vmatprep.mubr.msk.bf16.mxu1 %vm2690_vm1, %v2689_v6  ;;  %2504 = vmatpush3.bf16.msra.mxu1 %v2608_v27 }
 0xb3f   : > { %2505 = vmatprep.subr.bf16.mxu1 %v2689_v6 }
 0xb42   : > { %2506 = vmatpush3.bf16.msra.mxu1 %v2609_v43 }
 0xb43   : > { %2507 = vmatprep.subr.bf16.mxu1 %v2689_v6 }
 0xb46   : > { %2508 = vmatpush3.bf16.msra.mxu1 %v2610_v59 }
 0xb47   : > { %2509 = vmatprep.subr.bf16.mxu1 %v2689_v6  ;;  %v2314_v6 = vld [vmem:[%s699_s3] ss:$0 sm:$0xff] }
 0xb4a   : > { %2510 = vmatpush3.bf16.msra.mxu1 %v2611_v0 }
 0xc10   : > { %v1793_v24 = vpop.f32.mrb[32].mxu1 }
 0xc11   : > { %v1794_v13 = vadd.f32 %v2304_v23, %v1793_v24  ;;  %v2493_v26 = vpop.f32.mrb[33].mxu1 }
 0xc12   : > { %v1796_v29 = vpop.f32.mrb[34].mxu1 }
 0xc13   : > { %v1800_v7 = vadd.f32 %v1794_v13, %v2879_v8  ;;  %v1797_v30 = vadd.f32 %v2304_v23, %v1796_v29  ;;  %v2494_v28 = vpop.f32.mrb[35].mxu1 }
 0xc15   : > { %v1801_v31 = vadd.f32 %v1797_v30, %v2881_v9  ;;  %v1804_v32 = vsel %vm747_vm2, %v1800_v7, 0.0 }
 0xc16   : > { %1805 = vadd.xlane.f32.xlu1 %v1804_v32 }
 0xc17   : > { %v1807_v34 = vsel %vm747_vm2, %v1801_v31, 0.0 }
 0xc18   : > { %1808 = vadd.xlane.f32.xlu0 %v1807_v34 }
 0xca3   : > { %v1806_v35 = vpop.xlane.xlu1 %1805 }
 0xca4   : > { %v1811_v36 = vmul.f32 0.03125, %v1806_v35 }
 0xca5   : > { %v1809_v33 = vpop.xlane.xlu0 %1808 }
 0xca6   : > { %v1813_v37 = vsub.f32 %v1800_v7, %v1811_v36  ;;  %v1812_v38 = vmul.f32 0.03125, %v1809_v33 }
 0xca8   : > { %v1814_v8 = vsub.f32 %v1801_v31, %v1812_v38  ;;  %v1815_v39 = vmul.f32 %v1813_v37, %v1813_v37 }
 0xcaa   : > { %v1817_v40 = vsel %vm747_vm2, %v1815_v39, 0.0  ;;  %v1816_v9 = vmul.f32 %v1814_v8, %v1814_v8 }
 0xcab   : > { %1818 = vadd.xlane.f32.xlu0 %v1817_v40  ;;  %v2320_v40 = vld [vmem:[%s702_s0] ss:$0 sm:$0xff] }
 0xcac   : > { %v1820_v16 = vsel %vm747_vm2, %v1816_v9, 0.0 }
 0xcad   : > { %1821 = vadd.xlane.f32.xlu1 %v1820_v16 }
 0xd38   : > { %v1819_v44 = vpop.xlane.xlu0 %1818 }
 0xd39   : > { %v1823_v45 = vmul.f32 0.03125, %v1819_v44 }
 0xd3a   : > { %v1822_v46 = vpop.xlane.xlu1 %1821 }
 0xd3b   : > { %v1825_v47 = vadd.f32 1e-05, %v1823_v45  ;;  %v1824_v48 = vmul.f32 0.03125, %v1822_v46  ;;  %v2053_v46 = vld [vmem:[%s3262_s29] sm:$0xff] (!%p2303_p5) }
 0xd3d   : > { %2612 = vrsqrt.f32 %v1825_v47  ;;  %v1826_v49 = vadd.f32 1e-05, %v1824_v48  ;;  %v2705_v47 = vmov (!%p2303_p5), 0   ;;  %v2054_v48 = vld [vmem:[%s3262_s29 + $0x8] sm:$0xff] (!%p2303_p5) }
 0xd3e   : > { %2620 = vset.pattern.permute.xlu0 (!%p2303_p5), %v2705_v47 }
 0xd3f   : > { %2614 = vrsqrt.f32 %v1826_v49 }
 0xd47   : > { %v2613_v19 = vpop.eup %2612 }
 0xd48   : > { %v1829_v52 = vmul.f32 %v2613_v19, %v1813_v37 }
 0xd49   : > { %v2615_v25 = vpop.eup %2614 }
 0xd4a   : > { %v1830_v54 = vmul.f32 %v2615_v25, %v1814_v8  ;;  %v1837_v55 = vmul.f32 %v2308_v50, %v1829_v52 }
 0xd4c   : > { %v1838_v58 = vmul.f32 %v2308_v50, %v1830_v54  ;;  %v1845_v60 = vadd.f32 %v2309_v56, %v1837_v55 }
 0xd4e   : > { %v1846_v51 = vadd.f32 %v2309_v56, %v1838_v58 }
 0xd50   : > { %v1847_v53 = vpack.c.bf16 %v1846_v51, %v1845_v60 }
 0xd52   : > { %2500 = vmatmul.mubr.msk.bf16.vlgmr.msra.gmra.mrb[36].mxu0 %vm747_vm2, %v1847_v53 }
 0xe25   : > { %v1908_v62 = vpop.f32.mrb[36].mxu0 }
 0xe26   : > { %v1909_v1 = vadd.f32 %v2310_v57, %v1908_v62  ;;  %v2501_v5 = vpop.f32.mrb[37].mxu0 }
 0xe27   : > { %v1911_v63 = vpop.f32.mrb[38].mxu0 }
 0xe28   : > { %v1912_v2 = vadd.f32 %v2310_v57, %v1911_v63  ;;  %v2502_v4 = vpop.f32.mrb[39].mxu0  ;;  %v1915_v10 = vmax.f32 %v1909_v1, 0.0 }
 0xe2a   : > { %v1916_v11 = vmax.f32 %v1912_v2, 0.0 }
 0xe2c   : > { %v1917_v61 = vpack.c.bf16 %v1916_v11, %v1915_v10 }
 0xe2e   : > { %2512 = vmatmul.mubr.msk.bf16.vlgmr.msra.gmra.mrb[36].mxu1 %vm1957_vm7, %v1917_v61 }
 0xf01   : > { %v1995_v3 = vpop.f32.mrb[36].mxu1 }
 0xf02   : > { %v1996_v12 = vadd.f32 %v2314_v6, %v1995_v3  ;;  %v2513_v14 = vpop.f32.mrb[37].mxu1 }
 0xf03   : > { %v1998_v15 = vpop.f32.mrb[38].mxu1 }
 0xf04   : > { %v1999_v17 = vadd.f32 %v2314_v6, %v1998_v15  ;;  %v2514_v18 = vpop.f32.mrb[39].mxu1  ;;  %v2002_v20 = vadd.f32 %v1996_v12, %v1845_v60 }
 0xf06   : > { %v2006_v21 = vsel %vm747_vm2, %v2002_v20, 0.0  ;;  %v2003_v22 = vadd.f32 %v1999_v17, %v1846_v51 }
 0xf07   : > { %2007 = vadd.xlane.f32.xlu0 %v2006_v21 }
 0xf08   : > { %v2009_v23 = vsel %vm747_vm2, %v2003_v22, 0.0 }
 0xf09   : > { %2010 = vadd.xlane.f32.xlu1 %v2009_v23 }
 0xf94   : > { %v2008_v24 = vpop.xlane.xlu0 %2007 }
 0xf95   : > { %v2012_v13 = vmul.f32 0.03125, %v2008_v24 }
 0xf96   : > { %v2011_v26 = vpop.xlane.xlu1 %2010 }
 0xf97   : > { %v2014_v29 = vsub.f32 %v2002_v20, %v2012_v13  ;;  %v2013_v7 = vmul.f32 0.03125, %v2011_v26 }
 0xf99   : > { %v2015_v30 = vsub.f32 %v2003_v22, %v2013_v7  ;;  %v2016_v28 = vmul.f32 %v2014_v29, %v2014_v29 }
 0xf9b   : > { %v2018_v31 = vsel %vm747_vm2, %v2016_v28, 0.0  ;;  %v2017_v32 = vmul.f32 %v2015_v30, %v2015_v30 }
 0xf9c   : > { %2019 = vadd.xlane.f32.xlu0 %v2018_v31 }
 0xf9d   : > { %v2021_v34 = vsel %vm747_vm2, %v2017_v32, 0.0 }
 0xf9e   : > { %2022 = vadd.xlane.f32.xlu1 %v2021_v34 }
 0xfb2   : > { %2057 = vperm.xlu0 (!%p2303_p5), %2620, %v2053_v46  }
 0xfb6   : > { %2062 = vperm.xlu0 (!%p2303_p5), %2620, %v2054_v48  }
0x1029   : > { %v2020_v35 = vpop.xlane.xlu0 %2019 }
0x102a   : > { %v2024_v36 = vmul.f32 0.03125, %v2020_v35 }
0x102b   : > { %v2023_v33 = vpop.xlane.xlu1 %2022 }
0x102c   : > { %v2026_v37 = vadd.f32 1e-05, %v2024_v36  ;;  %v2025_v38 = vmul.f32 0.03125, %v2023_v33 }
0x102e   : > { %2616 = vrsqrt.f32 %v2026_v37  ;;  %v2027_v8 = vadd.f32 1e-05, %v2025_v38 }
0x1030   : > { %2618 = vrsqrt.f32 %v2027_v8 }
0x1031   : > { %v2058_v49 = vpop.permute.xlu0 (!%p2303_p5), %2057 }
0x1035   : > { %v2063_v25 = vpop.permute.xlu0 (!%p2303_p5), %2062 }
0x1038   : > { %v2617_v39 = vpop.eup %2616 }
0x1039   : > { %v2030_v9 = vmul.f32 %v2617_v39, %v2014_v29 }
0x103a   : > { %v2619_v16 = vpop.eup %2618 }
0x103b   : > { %v2038_v42 = vmul.f32 %v2320_v40, %v2030_v9  ;;  %v2031_v27 = vmul.f32 %v2619_v16, %v2015_v30  ;;  %2052 = sbr.rel (%p2303_p5) target bundleno = 4178 (0x1052), region = 96 }
0x103d   : > { %v2046_v43 = vadd.f32 %v2321_v41, %v2038_v42  ;;  %v2039_v44 = vmul.f32 %v2320_v40, %v2031_v27 }
0x103f   : > { %2048 = vst.msk [vmem:[#allocation2] sm:$0xff] %vm747_vm2, %v2046_v43  ;;  %v2047_v45 = vadd.f32 %v2321_v41, %v2039_v44  ;;  %v2065_v19 = vmul.f32 (!%p2303_p5), %v2058_v49, %v2046_v43 }
0x1041   : > { %2049 = vst.msk [vmem:[#allocation2 + $0x8] sm:$0xff] %vm747_vm2, %v2047_v45  ;;  %v2067_v50 = vsel (!%p2303_p5), %vm747_vm2, %v2065_v19, 0.0  ;;  %v2066_v54 = vmul.f32 (!%p2303_p5), %v2063_v25, %v2047_v45 }
0x1042   : > { %v2068_v52 = vrot.slane %v2067_v50, 4 }
0x1043   : > { %v2074_v56 = vsel %vm747_vm2, %v2066_v54, 0.0 }
0x1044   : > { %v2069_v55 = vadd.f32 %v2068_v52, %v2067_v50  ;;  %v2075_v60 = vrot.slane %v2074_v56, 4 }
0x1046   : > { %v2070_v58 = vrot.slane %v2069_v55, 2  ;;  %v2076_v53 = vadd.f32 %v2075_v60, %v2074_v56 }
0x1048   : > { %v2071_v51 = vadd.f32 %v2070_v58, %v2069_v55  ;;  %v2077_v59 = vrot.slane %v2076_v53, 2 }
0x104a   : > { %v2072_v0 = vrot.slane %v2071_v51, 1  ;;  %v2078_v57 = vadd.f32 %v2077_v59, %v2076_v53 }
0x104c   : > { %v2079_v62 = vrot.slane %v2078_v57, 1  ;;  %v2073_v1 = vadd.f32 %v2072_v0, %v2071_v51 }
0x104e   : > { %v2080_v5 = vadd.f32 %v2079_v62, %v2078_v57 }
0x1050   : > { %v2084_v63 = vsel %vm2083_vm8, %v2080_v5, %v2073_v1 }
0x1051   : > { %2087 = vst.msk [vmem:[#allocation3] sm:$0x3] %vm2086_vm9, %v2084_v63 }
0x1052 PF: > { %p2523_p6 = scmp.eq.s32.totalorder %s2805_s25, 1  ;;  %s2706_s28 = smov [#allocation3]  }
0x1053   : > { %s2095_s27 = sshll.u32 %s2706_s28, 4  ;;  %s2707_s30 = smov [#allocation5]   ;;  %s2096_s27 = int_to_ptr.vmem [resolvable:$true] %s2095_s27 }
0x1054   : > { %s2105_s20 = sshll.u32 %s2707_s30, 4  ;;  %s2621_s23 = scalar_lea.vmem %s2096_s27, 32  ;;  %s2106_s20 = int_to_ptr.vmem [resolvable:$true] %s2105_s20 }
0x1055   : > { %p2622_p7 = scmp.ne.s32.totalorder %s2096_s27, %s2621_s23  ;;  %p2628_p10 = scmp.lt.s32.totalorder %s2096_s27, %s2096_s27 }
0x1056   : > { %p2629_p11 = scmp.lt.s32.totalorder %s2621_s23, %s2621_s23 }
0x1057   : > { %p2623_p8 = pnand %p2622_p7, %p2523_p6 }
0x1058   : > { %p2630_p12 = por %p2629_p11, %p2628_p10 }
0x1059   : > { %p2624_p9 = pneg %p2623_p8 }
0x105b   : > { %p2631_p13 = pnand %p2630_p12, %p2624_p9 }
0x105d   : > { %2634 = shalt.err (!%p2631_p13)
}
0x105e   : > { %s3263_s17 = sld [smem:[#allocation16_spill]] }
0x1064   : > { %s2635_s24 = scalar_lea.hbm %s3263_s17, 32 }
0x1065   : > { %p2636_p0 = scmp.ne.s32.totalorder %s3263_s17, %s2635_s24  ;;  %p2641_p3 = scmp.lt.u32.totalorder %s2635_s24, %s3263_s17 }
0x1067   : > { %p2637_p1 = pnand %p2636_p0, %p2523_p6 }
0x1069   : > { %p2638_p2 = pneg %p2637_p1 }
0x106b   : > { %p2643_p4 = pnand %p2641_p3, %p2638_p2 }
0x106d   : > { %2646 = shalt.err (!%p2643_p4)
}
0x106e   : > { %2516 = dma.vmem_to_hbm [thread:$0]  (%p2523_p6), %s2096_s27, 32, %s3263_s17, [#allocation4]  }
0x106f   : > { %s2647_s26 = scalar_lea.vmem %s2106_s20, 256  ;;  %p2654_p9 = scmp.lt.s32.totalorder %s2106_s20, %s2106_s20 }
0x1070   : > { %p2648_p5 = scmp.ne.s32.totalorder %s2106_s20, %s2647_s26  ;;  %p2655_p10 = scmp.lt.s32.totalorder %s2647_s26, %s2647_s26 }
0x1072   : > { %p2649_p7 = pnand %p2648_p5, %p2523_p6  ;;  %p2656_p11 = por %p2655_p10, %p2654_p9 }
0x1074   : > { %p2650_p8 = pneg %p2649_p7 }
0x1076   : > { %p2657_p12 = pnand %p2656_p11, %p2650_p8 }
0x1078   : > { %2660 = shalt.err (!%p2657_p12)
}
0x1079   : > { %s3264_s23 = sld [smem:[#allocation17_spill]] }
0x107f   : > { %s2661_s16 = scalar_lea.hbm %s3264_s23, 256 }
0x1080   : > { %p2662_p13 = scmp.ne.s32.totalorder %s3264_s23, %s2661_s16  ;;  %p2667_p2 = scmp.lt.u32.totalorder %s2661_s16, %s3264_s23 }
0x1082   : > { %p2663_p0 = pnand %p2662_p13, %p2523_p6 }
0x1084   : > { %p2664_p1 = pneg %p2663_p0 }
0x1086   : > { %p2669_p3 = pnand %p2667_p2, %p2664_p1 }
0x1088   : > { %2672 = shalt.err (!%p2669_p3)
}
0x1089   : > { %s2708_s4 = smov 128  }
0x108a   : > { %2518 = dma.vmem_to_hbm [thread:$0]  (%p2523_p6), %s2106_s20, 256, %s3264_s23, [#allocation6], %s2708_s4, %s2708_s4, %s2702_s6  }
0x108b   : > { %2678 = dma.done.wait (%p2523_p6), [#allocation4], 32  }
0x108c   : > { %2680 = vsyncadd (%p2523_p6), [#allocation4], 4294967264 }
0x108d   : > { %2682 = dma.done.wait (%p2523_p6), [#allocation6], 256  }
0x108e   : > { %2684 = vsyncadd (%p2523_p6), [#allocation6], 4294967040 }
0x108f PF: > { %s3265_s19 = sld [smem:[#allocation9_spill]] }
0x1095   : > { %s30_s24 = sadd.s32 1, %s3265_s19  }
0x1096   : > { %p27_p4 = scmp.ge.s32.totalorder %s30_s24, 4  }
0x1098   :  { %29 = sbr.rel (!%p27_p4) target bundleno = 11 (0xb), region = 164 }
0x109f   :  { %2125 = vsyncpa [#allocation4], 1 }
0x10a0   :  { %2127 = vsyncpa [#allocation4 + $0x1], 1 }
0x10a1   :  { %2128 = vsyncpa [#allocation6], 1 }

</bundles_post_ra>
